<compile_context>
chip_gen: v7x
topology: tpu7x:2x2x1
jax: 0.10.0
libtpu: 0.0.40
codegen_flags: <defaults>
</compile_context>

<pallas_src>
import functools

import jax
import jax.numpy as jnp
from jax import lax
from jax.experimental import pallas as pl
from jax.experimental.pallas import tpu as pltpu

BN_EPS = 1e-5
LANE = 128


def _round_up(x, m):
    return (x + m - 1) // m * m


# --------------------------------------------------------------------------------------
# Kernel
# --------------------------------------------------------------------------------------
def _bottleneck_kernel(x_ref, xt_ref, xb_ref,
                       w1_ref, b1_ref, w2_ref, b2_ref, w3_ref, b3_ref,
                       out_ref, y1_ref, *, h_valid, w_valid):
    """One (batch image, H-row tile) block of the bottleneck.

    x_ref  : (1, HT, Wp, Cp)  bf16  main rows of the input tile (NHWC, W/channels padded)
    xt_ref : (1, 1,  Wp, Cp)  bf16  row just above the tile (clamped at the image border)
    xb_ref : (1, 1,  Wp, Cp)  bf16  row just below the tile (clamped at the image border)
    w1_ref : (Cp, Pp)         bf16  conv1 (1x1) weight with BN1 scale folded in
    b1_ref : (1, Pp)          f32   folded BN1 bias
    w2_ref : (9, Pp, Pp)      bf16  conv2 (3x3) weight, first dim = 3*kh + kw, BN2 folded
    b2_ref : (1, Pp)          f32
    w3_ref : (Pp, Cop)        bf16  conv3 (1x1) weight with BN3 scale folded in
    b3_ref : (1, Cop)         f32
    out_ref: (1, HT, Wp, Cop) bf16
    y1_ref : (HT+2, Wp, Pp)   bf16  VMEM scratch holding conv1 output incl. halo rows
    """
    i = pl.program_id(1)
    _, ht, wp, cp = x_ref.shape
    pp = w1_ref.shape[1]
    cop = w3_ref.shape[1]
    f32 = jnp.float32

    w1 = w1_ref[...]
    b1 = b1_ref[...]

    def conv1(x2d):                                          # (M, Cp) bf16 -> (M, Pp) bf16
        y = jnp.dot(x2d, w1, preferred_element_type=f32)
        return jnp.maximum(y + b1, 0.0).astype(jnp.bfloat16)

    # ---- conv1 (1x1) + BN1 bias + ReLU, written straight into the (ht+2)-row scratch ----
    y1_ref[pl.ds(1, ht)] = conv1(x_ref[0].reshape(ht * wp, cp)).reshape(ht, wp, pp)
    y1_ref[0] = conv1(xt_ref[0, 0])                          # halo row above
    y1_ref[ht + 1] = conv1(xb_ref[0, 0])                     # halo row below

    # Zero the halo rows at the image top/bottom borders (== the 3x3 conv's H zero padding).
    @pl.when(i == 0)
    def _():
        y1_ref[0] = jnp.zeros((wp, pp), jnp.bfloat16)

    @pl.when((i + 1) * ht >= h_valid)
    def _():
        y1_ref[ht + 1] = jnp.zeros((wp, pp), jnp.bfloat16)

    if h_valid % ht != 0:
        # Only generated when H % h_tile != 0: the last tile straddles the bottom border,
        # zero its out-of-image rows so the 3x3 conv's padding stays correct.
        @pl.when((i + 1) * ht > h_valid)
        def _():
            grow = i * ht + lax.broadcasted_iota(jnp.int32, (ht, 1, 1), 0)
            rows = y1_ref[pl.ds(1, ht)]
            y1_ref[pl.ds(1, ht)] = jnp.where(grow < h_valid, rows, jnp.zeros_like(rows))

    # ---- conv2 (3x3, stride 1, pad 1): 9 accumulating dots on direct scratch views.  The
    # +/-1 column shifts are applied to the f32 partial sums via pltpu.roll (XLU) ----------
    acc_l = jnp.zeros((ht * wp, pp), f32)      # taps kw=0 (input col -> output col+1)
    acc_c = jnp.zeros((ht * wp, pp), f32)      # taps kw=1 (center)
    acc_r = jnp.zeros((ht * wp, pp), f32)      # taps kw=2 (input col -> output col-1)
    for kh in range(3):
        a = y1_ref[pl.ds(kh, ht)].reshape(ht * wp, pp)       # aligned view: wp % 8 == 0
        acc_l = acc_l + jnp.dot(a, w2_ref[3 * kh + 0], preferred_element_type=f32)
        acc_c = acc_c + jnp.dot(a, w2_ref[3 * kh + 1], preferred_element_type=f32)
        acc_r = acc_r + jnp.dot(a, w2_ref[3 * kh + 2], preferred_element_type=f32)

    # Column index of every output position (flattened (h, w) -> h*wp + w).
    col = lax.broadcasted_iota(jnp.int32, (ht, wp, 1), 1).reshape(ht * wp, 1)
    m = ht * wp
    # Output col w takes the left-tap contribution of input col w-1 and the right-tap
    # contribution of input col w+1; the masks realize the W zero padding and also discard
    # roll wrap-around and padded-W columns.  (m-1 == roll by -1; positive static shift.)
    y2 = acc_c
    y2 = y2 + jnp.where(col >= 1, pltpu.roll(acc_l, 1, axis=0), 0.0)
    y2 = y2 + jnp.where(col < w_valid - 1, pltpu.roll(acc_r, m - 1, axis=0), 0.0)
    y2 = jnp.maximum(y2 + b2_ref[...], 0.0).astype(jnp.bfloat16)

    # ---- conv3 (1x1) + BN3 bias + residual + ReLU ----
    y3 = jnp.dot(y2, w3_ref[...], preferred_element_type=f32) + b3_ref[...]
    residual = x_ref[0].reshape(ht * wp, cp).astype(f32)     # re-read late: short live range
    out = jnp.maximum(y3 + residual, 0.0)
    out_ref[0] = out.reshape(ht, wp, cop).astype(out_ref.dtype)


# --------------------------------------------------------------------------------------
# Wrapper
# --------------------------------------------------------------------------------------
def _fold_bn(gamma, beta, mean, var):
    scale = gamma / jnp.sqrt(var + BN_EPS)
    bias = beta - mean * scale
    return scale, bias


def _vmem_capacity_bytes():
    try:
        return int(pltpu.get_tpu_info().vmem_capacity_bytes)
    except Exception:
        return 64 * 1024 * 1024  # conservative (v7x-sized) default


def _pick_h_tile(H, Wp, cp, pp, cop, vmem_bytes):
    """Largest H-row tile whose per-step working set fits the VMEM budget.

    Prefers a divisor of H (no padded rows); otherwise falls back to the largest fitting
    tile (H is zero-padded and the pad rows are masked in-kernel)."""
    budget = int(vmem_bytes * 0.45)
    # Constant weight/bias blocks, double-buffered by the default pipeline.
    weights = 2 * ((cp * pp + 9 * pp * pp + pp * cop) * 2 + (2 * pp + cop) * 4)

    def fits(ht):
        io = 2 * ((ht + 2) * Wp * cp * 2 + ht * Wp * cop * 2)   # dbl-buffered in/out blocks
        scratch = (ht + 2) * Wp * pp * 2                        # bf16 y1 scratch
        live = ht * Wp * (3 * pp + cop + cp) * 4 + ht * Wp * pp * 2
        return weights + io + scratch + live <= budget

    cap = max(1, min(H, 1024))
    best_any, best_div = 1, 1
    for ht in range(1, cap + 1):
        if fits(ht):
            best_any = ht
            if H % ht == 0:
                best_div = ht
    # Take the divisor unless padding buys a substantially larger tile.
    return best_div if 4 * best_div >= 3 * best_any else best_any


def _fold_weights(params, Cin, P, Cout, cp, pp, cop):
    """Fold BN scale into bf16 conv weights; pad channels to the lane-aligned sizes."""
    s1, b1 = _fold_bn(*params["bn1"])
    s2, b2 = _fold_bn(*params["bn2"])
    s3, b3 = _fold_bn(*params["bn3"])

    w1 = (params["conv1_w"][:, :, 0, 0] * s1[:, None]).T                  # (Cin, P)
    w1 = jnp.pad(w1, ((0, cp - Cin), (0, pp - P))).astype(jnp.bfloat16)

    w2 = params["conv2_w"] * s2[:, None, None, None]                      # (P, P, 3, 3) OIHW
    w2 = jnp.transpose(w2, (2, 3, 1, 0))                                  # (kh, kw, I, O)
    w2 = jnp.pad(w2, ((0, 0), (0, 0), (0, pp - P), (0, pp - P)))
    w2 = w2.reshape(9, pp, pp).astype(jnp.bfloat16)

    w3 = (params["conv3_w"][:, :, 0, 0] * s3[:, None]).T                  # (P, Cout)
    w3 = jnp.pad(w3, ((0, pp - P), (0, cop - Cout))).astype(jnp.bfloat16)

    b1 = jnp.pad(b1, (0, pp - P)).reshape(1, pp).astype(jnp.float32)
    b2 = jnp.pad(b2, (0, pp - P)).reshape(1, pp).astype(jnp.float32)
    b3 = jnp.pad(b3, (0, cop - Cout)).reshape(1, cop).astype(jnp.float32)
    return w1, b1, w2, b2, w3, b3


def _bottleneck_nhwc(x, folded, *, h_valid, w_valid, h_tile=None):
    """Fused bottleneck on padded-NHWC bf16 activations.

    x: (N, H, Wp, Cp) bf16, channels padded to a LANE multiple, W padded to a multiple
    of 8 (values in the pad region are ignored).  Returns (N, Hp, Wp, Cop) bf16 where
    rows >= h_valid / cols >= w_valid / channels >= Cout are junk.  Chaining consecutive
    blocks through this entry avoids NCHW<->NHWC boundary transposes."""
    w1, b1, w2, b2, w3, b3 = folded
    N, H, wp, cp = x.shape
    pp, cop = w1.shape[1], w3.shape[1]

    vmem_cap = _vmem_capacity_bytes()
    if h_tile is None:
        h_tile = _pick_h_tile(h_valid, wp, cp, pp, cop, vmem_cap)
    nh = pl.cdiv(h_valid, h_tile)
    hp = nh * h_tile
    if hp > H:
        x = jnp.pad(x, ((0, 0), (0, hp - H), (0, 0), (0, 0)))

    kernel = functools.partial(_bottleneck_kernel, h_valid=h_valid, w_valid=w_valid)

    def const_spec(shape):
        return pl.BlockSpec(shape, lambda n, i: (0,) * len(shape))

    def row_spec(index_map):
        return pl.BlockSpec((1, 1, wp, cp), index_map)

    in_specs = [
        pl.BlockSpec((1, h_tile, wp, cp), lambda n, i: (n, i, 0, 0)),                  # x tile
        row_spec(lambda n, i: (n, jnp.maximum(i * h_tile - 1, 0), 0, 0)),              # halo above
        row_spec(lambda n, i: (n, jnp.minimum((i + 1) * h_tile, hp - 1), 0, 0)),       # halo below
        const_spec((cp, pp)), const_spec((1, pp)),
        const_spec((9, pp, pp)), const_spec((1, pp)),
        const_spec((pp, cop)), const_spec((1, cop)),
    ]
    out_spec = pl.BlockSpec((1, h_tile, wp, cop), lambda n, i: (n, i, 0, 0))

    return pl.pallas_call(
        kernel,
        out_shape=jax.ShapeDtypeStruct((N, hp, wp, cop), jnp.bfloat16),
        grid=(N, nh),
        in_specs=in_specs,
        out_specs=out_spec,
        scratch_shapes=[pltpu.VMEM((h_tile + 2, wp, pp), jnp.bfloat16)],
        compiler_params=pltpu.CompilerParams(
            dimension_semantics=("parallel", "parallel"),
            vmem_limit_bytes=int(min(vmem_cap * 3 // 4, 100 * 1024 * 1024)),
        ),
    )(x, x, x, w1, b1, w2, b2, w3, b3)


def hrnet_bottleneck(x_nchw, params, h_tile=None):
    """HrNetBottleneck forward (stride=1, downsample=None), inference-mode BN, NCHW API."""
    N, Cin, H, W = x_nchw.shape
    P = params["conv1_w"].shape[0]
    Cout = params["conv3_w"].shape[0]
    assert Cout == Cin, "downsample=None requires inplanes == planes * expansion"

    cp = _round_up(Cin, LANE)
    pp = _round_up(P, LANE)
    cop = _round_up(Cout, LANE)
    assert cp == cop  # residual add needs aligned channel padding

    folded = _fold_weights(params, Cin, P, Cout, cp, pp, cop)

    # NCHW -> NHWC (channels on the lane axis), pad W to a multiple of 8 and channels to a
    # LANE multiple, cast to bf16.
    wp = _round_up(W, 8)
    x = jnp.transpose(x_nchw, (0, 2, 3, 1))
    x = jnp.pad(x, ((0, 0), (0, 0), (0, wp - W), (0, cp - Cin))).astype(jnp.bfloat16)

    out = _bottleneck_nhwc(x, folded, h_valid=H, w_valid=W, h_tile=h_tile)
    return jnp.transpose(out[:, :H, :W, :Cout].astype(jnp.float32), (0, 3, 1, 2))


# --------------------------------------------------------------------------------------
# References (pure JAX / lax.conv) and demo
# --------------------------------------------------------------------------------------
def reference_bottleneck(x_nchw, params):
    """Independent f32 reference: conv -> BN(running stats) -> ReLU chain + residual."""
    def bn(y, p):
        gamma, beta, mean, var = p
        s = gamma / jnp.sqrt(var + BN_EPS)
        b = beta - mean * s
        return y * s[None, :, None, None] + b[None, :, None, None]

    dn = ("NCHW", "OIHW", "NCHW")
    out = lax.conv_general_dilated(x_nchw, params["conv1_w"], (1, 1), "VALID",
                                   dimension_numbers=dn)
    out = jnp.maximum(bn(out, params["bn1"]), 0.0)
    out = lax.conv_general_dilated(out, params["conv2_w"], (1, 1), ((1, 1), (1, 1)),
                                   dimension_numbers=dn)
    out = jnp.maximum(bn(out, params["bn2"]), 0.0)
    out = lax.conv_general_dilated(out, params["conv3_w"], (1, 1), "VALID",
                                   dimension_numbers=dn)
    out = bn(out, params["bn3"])
    return jnp.maximum(out + x_nchw, 0.0)


def folded_bf16_reference(x_nchw, params):
    """Reference with the kernel's numerics: BN scale folded into bf16 weights, bf16
    activations at every matmul input, f32 accumulation/epilogue, bf16 output cast."""
    def q(a):  # bf16 quantize, compute in f32
        return a.astype(jnp.bfloat16).astype(jnp.float32)

    s1, b1 = _fold_bn(*params["bn1"])
    s2, b2 = _fold_bn(*params["bn2"])
    s3, b3 = _fold_bn(*params["bn3"])
    w1 = q(params["conv1_w"] * s1[:, None, None, None])
    w2 = q(params["conv2_w"] * s2[:, None, None, None])
    w3 = q(params["conv3_w"] * s3[:, None, None, None])

    dn = ("NCHW", "OIHW", "NCHW")
    xq = q(x_nchw)
    out = lax.conv_general_dilated(xq, w1, (1, 1), "VALID", dimension_numbers=dn)
    out = jnp.maximum(out + b1[None, :, None, None], 0.0)
    out = lax.conv_general_dilated(q(out), w2, (1, 1), ((1, 1), (1, 1)),
                                   dimension_numbers=dn)
    out = jnp.maximum(out + b2[None, :, None, None], 0.0)
    out = lax.conv_general_dilated(q(out), w3, (1, 1), "VALID", dimension_numbers=dn)
    out = out + b3[None, :, None, None]
    return q(jnp.maximum(out + xq, 0.0))


def make_params(key, inplanes, planes):
    expansion = 4
    ks = jax.random.split(key, 6)

    def bn_params(k, c):
        k1, k2, k3, k4 = jax.random.split(k, 4)
        gamma = jax.random.uniform(k1, (c,), jnp.float32, 0.5, 1.5)
        beta = 0.1 * jax.random.normal(k2, (c,), jnp.float32)
        mean = 0.1 * jax.random.normal(k3, (c,), jnp.float32)
        var = jax.random.uniform(k4, (c,), jnp.float32, 0.5, 1.5)
        return (gamma, beta, mean, var)

    return {
        "conv1_w": 0.2 * jax.random.normal(ks[0], (planes, inplanes, 1, 1), jnp.float32),
        "conv2_w": 0.2 * jax.random.normal(ks[1], (planes, planes, 3, 3), jnp.float32),
        "conv3_w": 0.2 * jax.random.normal(ks[2], (planes * expansion, planes, 1, 1),
                                           jnp.float32),
        "bn1": bn_params(ks[3], planes),
        "bn2": bn_params(ks[4], planes),
        "bn3": bn_params(ks[5], planes * expansion),
    }


if __name__ == "__main__":
    key = jax.random.PRNGKey(0)
    kp, kx1, kx2 = jax.random.split(key, 3)
    # inplanes must equal planes * expansion since downsample=None.
    N, inplanes, planes = 2, 16, 4
    params = make_params(kp, inplanes, planes)

    configs = [
        # (H, W, h_tiles): aligned shape (auto single tile + 2-tile halo exchange), then an
        # odd HRNet-ish shape exercising W padding and the non-divisible-H (padded) path.
        (16, 16, (None, 8)),
        (14, 14, (None, 4)),
    ]
    for (H, W, tiles), kx in zip(configs, (kx1, kx2)):
        x = jax.random.normal(kx, (N, inplanes, H, W), jnp.float32)  # NCHW like PyTorch
        ref_f32 = jax.block_until_ready(reference_bottleneck(x, params))
        ref_q = jax.block_until_ready(folded_bf16_reference(x, params))

        for ht in tiles:
            out = jax.block_until_ready(hrnet_bottleneck(x, params, h_tile=ht))
            assert out.shape == (N, inplanes, H, W)
            # Tight check vs. a reference with matching bf16/f32 numerics.
            err_q = float(jnp.max(jnp.abs(out - ref_q)))
            assert jnp.allclose(out, ref_q, rtol=2e-2, atol=2e-2), \
                f"H={H} W={W} h_tile={ht}: max abs diff vs bf16-matched reference {err_q}"
            # Loose sanity vs. the pure-f32 reference (bounds the bf16 quantization effect).
            err_f = float(jnp.max(jnp.abs(out - ref_f32)))
            assert jnp.allclose(out, ref_f32, rtol=1.5e-1, atol=1.5e-1), \
                f"H={H} W={W} h_tile={ht}: max abs diff vs f32 reference {err_f}"

    print("KERNEL_OK")
</pallas_src>

<mosaic_0001>
module attributes {stable_mosaic.version = 11 : i64} {
  func.func @_bottleneck_kernel(%arg0: i32, %arg1: i32, %arg2: memref<1x16x16x128xbf16, #tpu.memory_space<vmem>>, %arg3: memref<1x1x16x128xbf16, #tpu.memory_space<vmem>>, %arg4: memref<1x1x16x128xbf16, #tpu.memory_space<vmem>>, %arg5: memref<128x128xbf16, #tpu.memory_space<vmem>>, %arg6: memref<1x128xf32, #tpu.memory_space<vmem>>, %arg7: memref<9x128x128xbf16, #tpu.memory_space<vmem>>, %arg8: memref<1x128xf32, #tpu.memory_space<vmem>>, %arg9: memref<128x128xbf16, #tpu.memory_space<vmem>>, %arg10: memref<1x128xf32, #tpu.memory_space<vmem>>, %arg11: memref<1x16x16x128xbf16, #tpu.memory_space<vmem>>, %arg12: memref<18x16x128xbf16, #tpu.memory_space<vmem>>) attributes {dimension_semantics = [#tpu.dimension_semantics<parallel>, #tpu.dimension_semantics<parallel>], iteration_bounds = array<i64: 2, 1>, scalar_prefetch = 0 : i64, scratch_operands = 1 : i64, tpu.core_type = #tpu.core_type<tc>, window_params = [{transform_indices = @transform_0, window_bounds = array<i64: 1, 16, 16, 128>}, {transform_indices = @transform_1, window_bounds = array<i64: 1, 1, 16, 128>}, {transform_indices = @transform_2, window_bounds = array<i64: 1, 1, 16, 128>}, {pipeline_mode = #tpu.pipeline_mode<synchronous>, transform_indices = @transform_3, window_bounds = array<i64: 128, 128>}, {pipeline_mode = #tpu.pipeline_mode<synchronous>, transform_indices = @transform_4, window_bounds = array<i64: 1, 128>}, {pipeline_mode = #tpu.pipeline_mode<synchronous>, transform_indices = @transform_5, window_bounds = array<i64: 9, 128, 128>}, {pipeline_mode = #tpu.pipeline_mode<synchronous>, transform_indices = @transform_6, window_bounds = array<i64: 1, 128>}, {pipeline_mode = #tpu.pipeline_mode<synchronous>, transform_indices = @transform_7, window_bounds = array<i64: 128, 128>}, {pipeline_mode = #tpu.pipeline_mode<synchronous>, transform_indices = @transform_8, window_bounds = array<i64: 1, 128>}, {transform_indices = @transform_9, window_bounds = array<i64: 1, 16, 16, 128>}]} {
    %c0 = arith.constant 0 : index
    %c0_0 = arith.constant 0 : index
    %0 = vector.load %arg5[%c0, %c0_0] : memref<128x128xbf16, #tpu.memory_space<vmem>>, vector<128x128xbf16>
    %c0_1 = arith.constant 0 : index
    %c0_2 = arith.constant 0 : index
    %1 = vector.load %arg6[%c0_1, %c0_2] : memref<1x128xf32, #tpu.memory_space<vmem>>, vector<1x128xf32>
    %c0_3 = arith.constant 0 : index
    %c0_4 = arith.constant 0 : index
    %c0_5 = arith.constant 0 : index
    %c0_6 = arith.constant 0 : index
    %2 = vector.load %arg2[%c0_3, %c0_4, %c0_5, %c0_6] : memref<1x16x16x128xbf16, #tpu.memory_space<vmem>>, vector<1x16x16x128xbf16>
    %3 = vector.shape_cast %2 : vector<1x16x16x128xbf16> to vector<16x16x128xbf16>
    %4 = vector.shape_cast %3 : vector<16x16x128xbf16> to vector<256x128xbf16>
    %cst = arith.constant dense<0.000000e+00> : vector<256x128xf32>
    %5 = tpu.matmul %4, %0, %cst {dimension_numbers = #tpu.dot_dimension_numbers<[1], [0], [0], [1], [0, 0, 1, 1], [], []>} : vector<256x128xbf16>, vector<128x128xbf16>, vector<256x128xf32> -> vector<256x128xf32>
    %6 = vector.broadcast %1 : vector<1x128xf32> to vector<256x128xf32>
    %7 = arith.addf %5, %6 : vector<256x128xf32>
    %cst_7 = arith.constant 0.000000e+00 : f32
    %8 = vector.broadcast %cst_7 : f32 to vector<256x128xf32>
    %9 = arith.maximumf %7, %8 : vector<256x128xf32>
    %10 = arith.truncf %9 : vector<256x128xf32> to vector<256x128xbf16>
    %11 = vector.shape_cast %10 : vector<256x128xbf16> to vector<16x16x128xbf16>
    %c1 = arith.constant 1 : index
    %c0_8 = arith.constant 0 : index
    %c0_9 = arith.constant 0 : index
    %12 = vector.load %arg12[%c1, %c0_8, %c0_9] : memref<18x16x128xbf16, #tpu.memory_space<vmem>>, vector<16x16x128xbf16>
    tpu.vector_store %arg12[%c1, %c0_8, %c0_9], %11 {strides = array<i32>} : memref<18x16x128xbf16, #tpu.memory_space<vmem>>, vector<16x16x128xbf16>,
    %c0_10 = arith.constant 0 : index
    %c0_11 = arith.constant 0 : index
    %c0_12 = arith.constant 0 : index
    %c0_13 = arith.constant 0 : index
    %13 = vector.load %arg3[%c0_10, %c0_11, %c0_12, %c0_13] : memref<1x1x16x128xbf16, #tpu.memory_space<vmem>>, vector<1x1x16x128xbf16>
    %14 = vector.shape_cast %13 : vector<1x1x16x128xbf16> to vector<16x128xbf16>
    %cst_14 = arith.constant dense<0.000000e+00> : vector<16x128xf32>
    %15 = tpu.matmul %14, %0, %cst_14 {dimension_numbers = #tpu.dot_dimension_numbers<[1], [0], [0], [1], [0, 0, 1, 1], [], []>} : vector<16x128xbf16>, vector<128x128xbf16>, vector<16x128xf32> -> vector<16x128xf32>
    %16 = vector.broadcast %1 : vector<1x128xf32> to vector<16x128xf32>
    %17 = arith.addf %15, %16 : vector<16x128xf32>
    %cst_15 = arith.constant 0.000000e+00 : f32
    %18 = vector.broadcast %cst_15 : f32 to vector<16x128xf32>
    %19 = arith.maximumf %17, %18 : vector<16x128xf32>
    %20 = arith.truncf %19 : vector<16x128xf32> to vector<16x128xbf16>
    %c0_16 = arith.constant 0 : index
    %c0_17 = arith.constant 0 : index
    %c0_18 = arith.constant 0 : index
    %21 = vector.load %arg12[%c0_16, %c0_17, %c0_18] : memref<18x16x128xbf16, #tpu.memory_space<vmem>>, vector<1x16x128xbf16>
    %22 = vector.shape_cast %21 : vector<1x16x128xbf16> to vector<16x128xbf16>
    %23 = vector.shape_cast %20 : vector<16x128xbf16> to vector<1x16x128xbf16>
    tpu.vector_store %arg12[%c0_16, %c0_17, %c0_18], %23 {strides = array<i32>} : memref<18x16x128xbf16, #tpu.memory_space<vmem>>, vector<1x16x128xbf16>,
    %c0_19 = arith.constant 0 : index
    %c0_20 = arith.constant 0 : index
    %c0_21 = arith.constant 0 : index
    %c0_22 = arith.constant 0 : index
    %24 = vector.load %arg4[%c0_19, %c0_20, %c0_21, %c0_22] : memref<1x1x16x128xbf16, #tpu.memory_space<vmem>>, vector<1x1x16x128xbf16>
    %25 = vector.shape_cast %24 : vector<1x1x16x128xbf16> to vector<16x128xbf16>
    %cst_23 = arith.constant dense<0.000000e+00> : vector<16x128xf32>
    %26 = tpu.matmul %25, %0, %cst_23 {dimension_numbers = #tpu.dot_dimension_numbers<[1], [0], [0], [1], [0, 0, 1, 1], [], []>} : vector<16x128xbf16>, vector<128x128xbf16>, vector<16x128xf32> -> vector<16x128xf32>
    %27 = vector.broadcast %1 : vector<1x128xf32> to vector<16x128xf32>
    %28 = arith.addf %26, %27 : vector<16x128xf32>
    %cst_24 = arith.constant 0.000000e+00 : f32
    %29 = vector.broadcast %cst_24 : f32 to vector<16x128xf32>
    %30 = arith.maximumf %28, %29 : vector<16x128xf32>
    %31 = arith.truncf %30 : vector<16x128xf32> to vector<16x128xbf16>
    %c17 = arith.constant 17 : index
    %c0_25 = arith.constant 0 : index
    %c0_26 = arith.constant 0 : index
    %32 = vector.load %arg12[%c17, %c0_25, %c0_26] : memref<18x16x128xbf16, #tpu.memory_space<vmem>>, vector<1x16x128xbf16>
    %33 = vector.shape_cast %32 : vector<1x16x128xbf16> to vector<16x128xbf16>
    %34 = vector.shape_cast %31 : vector<16x128xbf16> to vector<1x16x128xbf16>
    tpu.vector_store %arg12[%c17, %c0_25, %c0_26], %34 {strides = array<i32>} : memref<18x16x128xbf16, #tpu.memory_space<vmem>>, vector<1x16x128xbf16>,
    %c0_i32 = arith.constant 0 : i32
    %35 = arith.cmpi eq, %arg1, %c0_i32 : i32
    %36 = arith.extui %35 : i1 to i32
    %c0_i32_27 = arith.constant 0 : i32
    %37 = arith.cmpi ne, %36, %c0_i32_27 : i32
    scf.if %37 {
      %cst_92 = arith.constant 0.000000e+00 : bf16
      %129 = vector.broadcast %cst_92 : bf16 to vector<16x128xbf16>
      %c0_93 = arith.constant 0 : index
      %c0_94 = arith.constant 0 : index
      %c0_95 = arith.constant 0 : index
      %130 = vector.load %arg12[%c0_93, %c0_94, %c0_95] : memref<18x16x128xbf16, #tpu.memory_space<vmem>>, vector<1x16x128xbf16>
      %131 = vector.shape_cast %130 : vector<1x16x128xbf16> to vector<16x128xbf16>
      %132 = vector.shape_cast %129 : vector<16x128xbf16> to vector<1x16x128xbf16>
      tpu.vector_store %arg12[%c0_93, %c0_94, %c0_95], %132 {strides = array<i32>} : memref<18x16x128xbf16, #tpu.memory_space<vmem>>, vector<1x16x128xbf16>,
    } else {
    }
    %c1_i32 = arith.constant 1 : i32
    %38 = arith.addi %arg1, %c1_i32 : i32
    %c16_i32 = arith.constant 16 : i32
    %39 = arith.muli %38, %c16_i32 : i32
    %c16_i32_28 = arith.constant 16 : i32
    %40 = arith.cmpi sge, %39, %c16_i32_28 : i32
    %41 = arith.extui %40 : i1 to i32
    %c0_i32_29 = arith.constant 0 : i32
    %42 = arith.cmpi ne, %41, %c0_i32_29 : i32
    scf.if %42 {
      %cst_92 = arith.constant 0.000000e+00 : bf16
      %129 = vector.broadcast %cst_92 : bf16 to vector<16x128xbf16>
      %c17_93 = arith.constant 17 : index
      %c0_94 = arith.constant 0 : index
      %c0_95 = arith.constant 0 : index
      %130 = vector.load %arg12[%c17_93, %c0_94, %c0_95] : memref<18x16x128xbf16, #tpu.memory_space<vmem>>, vector<1x16x128xbf16>
      %131 = vector.shape_cast %130 : vector<1x16x128xbf16> to vector<16x128xbf16>
      %132 = vector.shape_cast %129 : vector<16x128xbf16> to vector<1x16x128xbf16>
      tpu.vector_store %arg12[%c17_93, %c0_94, %c0_95], %132 {strides = array<i32>} : memref<18x16x128xbf16, #tpu.memory_space<vmem>>, vector<1x16x128xbf16>,
    } else {
    }
    %cst_30 = arith.constant 0.000000e+00 : f32
    %43 = vector.broadcast %cst_30 : f32 to vector<256x128xf32>
    %cst_31 = arith.constant 0.000000e+00 : f32
    %44 = vector.broadcast %cst_31 : f32 to vector<256x128xf32>
    %cst_32 = arith.constant 0.000000e+00 : f32
    %45 = vector.broadcast %cst_32 : f32 to vector<256x128xf32>
    %c0_33 = arith.constant 0 : index
    %c0_34 = arith.constant 0 : index
    %c0_35 = arith.constant 0 : index
    %46 = vector.load %arg12[%c0_33, %c0_34, %c0_35] : memref<18x16x128xbf16, #tpu.memory_space<vmem>>, vector<16x16x128xbf16>
    %47 = vector.shape_cast %46 : vector<16x16x128xbf16> to vector<256x128xbf16>
    %c0_36 = arith.constant 0 : index
    %c0_37 = arith.constant 0 : index
    %c0_38 = arith.constant 0 : index
    %48 = vector.load %arg7[%c0_36, %c0_37, %c0_38] : memref<9x128x128xbf16, #tpu.memory_space<vmem>>, vector<1x128x128xbf16>
    %49 = vector.shape_cast %48 : vector<1x128x128xbf16> to vector<128x128xbf16>
    %cst_39 = arith.constant dense<0.000000e+00> : vector<256x128xf32>
    %50 = tpu.matmul %47, %49, %cst_39 {dimension_numbers = #tpu.dot_dimension_numbers<[1], [0], [0], [1], [0, 0, 1, 1], [], []>} : vector<256x128xbf16>, vector<128x128xbf16>, vector<256x128xf32> -> vector<256x128xf32>
    %51 = arith.addf %43, %50 : vector<256x128xf32>
    %c1_40 = arith.constant 1 : index
    %c0_41 = arith.constant 0 : index
    %c0_42 = arith.constant 0 : index
    %52 = vector.load %arg7[%c1_40, %c0_41, %c0_42] : memref<9x128x128xbf16, #tpu.memory_space<vmem>>, vector<1x128x128xbf16>
    %53 = vector.shape_cast %52 : vector<1x128x128xbf16> to vector<128x128xbf16>
    %cst_43 = arith.constant dense<0.000000e+00> : vector<256x128xf32>
    %54 = tpu.matmul %47, %53, %cst_43 {dimension_numbers = #tpu.dot_dimension_numbers<[1], [0], [0], [1], [0, 0, 1, 1], [], []>} : vector<256x128xbf16>, vector<128x128xbf16>, vector<256x128xf32> -> vector<256x128xf32>
    %55 = arith.addf %44, %54 : vector<256x128xf32>
    %c2 = arith.constant 2 : index
    %c0_44 = arith.constant 0 : index
    %c0_45 = arith.constant 0 : index
    %56 = vector.load %arg7[%c2, %c0_44, %c0_45] : memref<9x128x128xbf16, #tpu.memory_space<vmem>>, vector<1x128x128xbf16>
    %57 = vector.shape_cast %56 : vector<1x128x128xbf16> to vector<128x128xbf16>
    %cst_46 = arith.constant dense<0.000000e+00> : vector<256x128xf32>
    %58 = tpu.matmul %47, %57, %cst_46 {dimension_numbers = #tpu.dot_dimension_numbers<[1], [0], [0], [1], [0, 0, 1, 1], [], []>} : vector<256x128xbf16>, vector<128x128xbf16>, vector<256x128xf32> -> vector<256x128xf32>
    %59 = arith.addf %45, %58 : vector<256x128xf32>
    %c1_47 = arith.constant 1 : index
    %c0_48 = arith.constant 0 : index
    %c0_49 = arith.constant 0 : index
    %60 = vector.load %arg12[%c1_47, %c0_48, %c0_49] : memref<18x16x128xbf16, #tpu.memory_space<vmem>>, vector<16x16x128xbf16>
    %61 = vector.shape_cast %60 : vector<16x16x128xbf16> to vector<256x128xbf16>
    %c3 = arith.constant 3 : index
    %c0_50 = arith.constant 0 : index
    %c0_51 = arith.constant 0 : index
    %62 = vector.load %arg7[%c3, %c0_50, %c0_51] : memref<9x128x128xbf16, #tpu.memory_space<vmem>>, vector<1x128x128xbf16>
    %63 = vector.shape_cast %62 : vector<1x128x128xbf16> to vector<128x128xbf16>
    %cst_52 = arith.constant dense<0.000000e+00> : vector<256x128xf32>
    %64 = tpu.matmul %61, %63, %cst_52 {dimension_numbers = #tpu.dot_dimension_numbers<[1], [0], [0], [1], [0, 0, 1, 1], [], []>} : vector<256x128xbf16>, vector<128x128xbf16>, vector<256x128xf32> -> vector<256x128xf32>
    %65 = arith.addf %51, %64 : vector<256x128xf32>
    %c4 = arith.constant 4 : index
    %c0_53 = arith.constant 0 : index
    %c0_54 = arith.constant 0 : index
    %66 = vector.load %arg7[%c4, %c0_53, %c0_54] : memref<9x128x128xbf16, #tpu.memory_space<vmem>>, vector<1x128x128xbf16>
    %67 = vector.shape_cast %66 : vector<1x128x128xbf16> to vector<128x128xbf16>
    %cst_55 = arith.constant dense<0.000000e+00> : vector<256x128xf32>
    %68 = tpu.matmul %61, %67, %cst_55 {dimension_numbers = #tpu.dot_dimension_numbers<[1], [0], [0], [1], [0, 0, 1, 1], [], []>} : vector<256x128xbf16>, vector<128x128xbf16>, vector<256x128xf32> -> vector<256x128xf32>
    %69 = arith.addf %55, %68 : vector<256x128xf32>
    %c5 = arith.constant 5 : index
    %c0_56 = arith.constant 0 : index
    %c0_57 = arith.constant 0 : index
    %70 = vector.load %arg7[%c5, %c0_56, %c0_57] : memref<9x128x128xbf16, #tpu.memory_space<vmem>>, vector<1x128x128xbf16>
    %71 = vector.shape_cast %70 : vector<1x128x128xbf16> to vector<128x128xbf16>
    %cst_58 = arith.constant dense<0.000000e+00> : vector<256x128xf32>
    %72 = tpu.matmul %61, %71, %cst_58 {dimension_numbers = #tpu.dot_dimension_numbers<[1], [0], [0], [1], [0, 0, 1, 1], [], []>} : vector<256x128xbf16>, vector<128x128xbf16>, vector<256x128xf32> -> vector<256x128xf32>
    %73 = arith.addf %59, %72 : vector<256x128xf32>
    %c2_59 = arith.constant 2 : index
    %c0_60 = arith.constant 0 : index
    %c0_61 = arith.constant 0 : index
    %74 = vector.load %arg12[%c2_59, %c0_60, %c0_61] : memref<18x16x128xbf16, #tpu.memory_space<vmem>>, vector<16x16x128xbf16>
    %75 = vector.shape_cast %74 : vector<16x16x128xbf16> to vector<256x128xbf16>
    %c6 = arith.constant 6 : index
    %c0_62 = arith.constant 0 : index
    %c0_63 = arith.constant 0 : index
    %76 = vector.load %arg7[%c6, %c0_62, %c0_63] : memref<9x128x128xbf16, #tpu.memory_space<vmem>>, vector<1x128x128xbf16>
    %77 = vector.shape_cast %76 : vector<1x128x128xbf16> to vector<128x128xbf16>
    %cst_64 = arith.constant dense<0.000000e+00> : vector<256x128xf32>
    %78 = tpu.matmul %75, %77, %cst_64 {dimension_numbers = #tpu.dot_dimension_numbers<[1], [0], [0], [1], [0, 0, 1, 1], [], []>} : vector<256x128xbf16>, vector<128x128xbf16>, vector<256x128xf32> -> vector<256x128xf32>
    %79 = arith.addf %65, %78 : vector<256x128xf32>
    %c7 = arith.constant 7 : index
    %c0_65 = arith.constant 0 : index
    %c0_66 = arith.constant 0 : index
    %80 = vector.load %arg7[%c7, %c0_65, %c0_66] : memref<9x128x128xbf16, #tpu.memory_space<vmem>>, vector<1x128x128xbf16>
    %81 = vector.shape_cast %80 : vector<1x128x128xbf16> to vector<128x128xbf16>
    %cst_67 = arith.constant dense<0.000000e+00> : vector<256x128xf32>
    %82 = tpu.matmul %75, %81, %cst_67 {dimension_numbers = #tpu.dot_dimension_numbers<[1], [0], [0], [1], [0, 0, 1, 1], [], []>} : vector<256x128xbf16>, vector<128x128xbf16>, vector<256x128xf32> -> vector<256x128xf32>
    %83 = arith.addf %69, %82 : vector<256x128xf32>
    %c8 = arith.constant 8 : index
    %c0_68 = arith.constant 0 : index
    %c0_69 = arith.constant 0 : index
    %84 = vector.load %arg7[%c8, %c0_68, %c0_69] : memref<9x128x128xbf16, #tpu.memory_space<vmem>>, vector<1x128x128xbf16>
    %85 = vector.shape_cast %84 : vector<1x128x128xbf16> to vector<128x128xbf16>
    %cst_70 = arith.constant dense<0.000000e+00> : vector<256x128xf32>
    %86 = tpu.matmul %75, %85, %cst_70 {dimension_numbers = #tpu.dot_dimension_numbers<[1], [0], [0], [1], [0, 0, 1, 1], [], []>} : vector<256x128xbf16>, vector<128x128xbf16>, vector<256x128xf32> -> vector<256x128xf32>
    %87 = arith.addf %73, %86 : vector<256x128xf32>
    %88 = tpu.iota {dimensions = array<i32: 1>} : vector<16x16x1xi32>
    %89 = vector.shape_cast %88 : vector<16x16x1xi32> to vector<256x1xi32>
    %c1_i32_71 = arith.constant 1 : i32
    %90 = vector.broadcast %c1_i32_71 : i32 to vector<256x1xi32>
    %91 = arith.cmpi sge, %89, %90 : vector<256x1xi32>
    %c1_i32_72 = arith.constant 1 : i32
    %92 = tpu.dynamic_rotate %79 by %c1_i32_72 dim 0 : vector<256x128xf32>, i32 -> vector<256x128xf32>
    %cst_73 = arith.constant 0.000000e+00 : f32
    %93 = vector.shape_cast %91 : vector<256x1xi1> to vector<256x1xi1>
    %94 = vector.broadcast %93 : vector<256x1xi1> to vector<256x128xi1>
    %95 = vector.broadcast %cst_73 : f32 to vector<256x128xf32>
    %96 = arith.select %94, %92, %95 : vector<256x128xi1>, vector<256x128xf32>
    %97 = arith.addf %83, %96 : vector<256x128xf32>
    %c15_i32 = arith.constant 15 : i32
    %98 = vector.broadcast %c15_i32 : i32 to vector<256x1xi32>
    %99 = arith.cmpi slt, %89, %98 : vector<256x1xi32>
    %c255_i32 = arith.constant 255 : i32
    %100 = tpu.dynamic_rotate %87 by %c255_i32 dim 0 : vector<256x128xf32>, i32 -> vector<256x128xf32>
    %cst_74 = arith.constant 0.000000e+00 : f32
    %101 = vector.shape_cast %99 : vector<256x1xi1> to vector<256x1xi1>
    %102 = vector.broadcast %101 : vector<256x1xi1> to vector<256x128xi1>
    %103 = vector.broadcast %cst_74 : f32 to vector<256x128xf32>
    %104 = arith.select %102, %100, %103 : vector<256x128xi1>, vector<256x128xf32>
    %105 = arith.addf %97, %104 : vector<256x128xf32>
    %c0_75 = arith.constant 0 : index
    %c0_76 = arith.constant 0 : index
    %106 = vector.load %arg8[%c0_75, %c0_76] : memref<1x128xf32, #tpu.memory_space<vmem>>, vector<1x128xf32>
    %107 = vector.broadcast %106 : vector<1x128xf32> to vector<256x128xf32>
    %108 = arith.addf %105, %107 : vector<256x128xf32>
    %cst_77 = arith.constant 0.000000e+00 : f32
    %109 = vector.broadcast %cst_77 : f32 to vector<256x128xf32>
    %110 = arith.maximumf %108, %109 : vector<256x128xf32>
    %111 = arith.truncf %110 : vector<256x128xf32> to vector<256x128xbf16>
    %c0_78 = arith.constant 0 : index
    %c0_79 = arith.constant 0 : index
    %112 = vector.load %arg9[%c0_78, %c0_79] : memref<128x128xbf16, #tpu.memory_space<vmem>>, vector<128x128xbf16>
    %cst_80 = arith.constant dense<0.000000e+00> : vector<256x128xf32>
    %113 = tpu.matmul %111, %112, %cst_80 {dimension_numbers = #tpu.dot_dimension_numbers<[1], [0], [0], [1], [0, 0, 1, 1], [], []>} : vector<256x128xbf16>, vector<128x128xbf16>, vector<256x128xf32> -> vector<256x128xf32>
    %c0_81 = arith.constant 0 : index
    %c0_82 = arith.constant 0 : index
    %114 = vector.load %arg10[%c0_81, %c0_82] : memref<1x128xf32, #tpu.memory_space<vmem>>, vector<1x128xf32>
    %115 = vector.broadcast %114 : vector<1x128xf32> to vector<256x128xf32>
    %116 = arith.addf %113, %115 : vector<256x128xf32>
    %c0_83 = arith.constant 0 : index
    %c0_84 = arith.constant 0 : index
    %c0_85 = arith.constant 0 : index
    %c0_86 = arith.constant 0 : index
    %117 = vector.load %arg2[%c0_83, %c0_84, %c0_85, %c0_86] : memref<1x16x16x128xbf16, #tpu.memory_space<vmem>>, vector<1x16x16x128xbf16>
    %118 = vector.shape_cast %117 : vector<1x16x16x128xbf16> to vector<16x16x128xbf16>
    %119 = vector.shape_cast %118 : vector<16x16x128xbf16> to vector<256x128xbf16>
    %120 = arith.extf %119 : vector<256x128xbf16> to vector<256x128xf32>
    %121 = arith.addf %116, %120 : vector<256x128xf32>
    %cst_87 = arith.constant 0.000000e+00 : f32
    %122 = vector.broadcast %cst_87 : f32 to vector<256x128xf32>
    %123 = arith.maximumf %121, %122 : vector<256x128xf32>
    %124 = vector.shape_cast %123 : vector<256x128xf32> to vector<16x16x128xf32>
    %125 = arith.truncf %124 : vector<16x16x128xf32> to vector<16x16x128xbf16>
    %c0_88 = arith.constant 0 : index
    %c0_89 = arith.constant 0 : index
    %c0_90 = arith.constant 0 : index
    %c0_91 = arith.constant 0 : index
    %126 = vector.load %arg11[%c0_88, %c0_89, %c0_90, %c0_91] : memref<1x16x16x128xbf16, #tpu.memory_space<vmem>>, vector<1x16x16x128xbf16>
    %127 = vector.shape_cast %126 : vector<1x16x16x128xbf16> to vector<16x16x128xbf16>
    %128 = vector.shape_cast %125 : vector<16x16x128xbf16> to vector<1x16x16x128xbf16>
    tpu.vector_store %arg11[%c0_88, %c0_89, %c0_90, %c0_91], %128 {strides = array<i32>} : memref<1x16x16x128xbf16, #tpu.memory_space<vmem>>, vector<1x16x16x128xbf16>,
    return
  }
  func.func @transform_0(%arg0: i32, %arg1: i32) -> (i32, i32, i32, i32) {
    %c0_i32 = arith.constant 0 : i32
    %c0_i32_0 = arith.constant 0 : i32
    %c0_i32_1 = arith.constant 0 : i32
    return %arg0, %arg1, %c0_i32, %c0_i32_0 : i32, i32, i32, i32
  }
  func.func @transform_1(%arg0: i32, %arg1: i32) -> (i32, i32, i32, i32) {
    %c16_i32 = arith.constant 16 : i32
    %0 = arith.muli %arg1, %c16_i32 : i32
    %c1_i32 = arith.constant 1 : i32
    %1 = arith.subi %0, %c1_i32 : i32
    %c0_i32 = arith.constant 0 : i32
    %2 = arith.maxsi %1, %c0_i32 : i32
    %c0_i32_0 = arith.constant 0 : i32
    %c0_i32_1 = arith.constant 0 : i32
    %c0_i32_2 = arith.constant 0 : i32
    return %arg0, %2, %c0_i32_0, %c0_i32_1 : i32, i32, i32, i32
  }
  func.func @transform_2(%arg0: i32, %arg1: i32) -> (i32, i32, i32, i32) {
    %c1_i32 = arith.constant 1 : i32
    %0 = arith.addi %arg1, %c1_i32 : i32
    %c16_i32 = arith.constant 16 : i32
    %1 = arith.muli %0, %c16_i32 : i32
    %c15_i32 = arith.constant 15 : i32
    %2 = arith.minsi %1, %c15_i32 : i32
    %c0_i32 = arith.constant 0 : i32
    %c0_i32_0 = arith.constant 0 : i32
    %c0_i32_1 = arith.constant 0 : i32
    return %arg0, %2, %c0_i32, %c0_i32_0 : i32, i32, i32, i32
  }
  func.func @transform_3(%arg0: i32, %arg1: i32) -> (i32, i32) {
    %c0_i32 = arith.constant 0 : i32
    %c0_i32_0 = arith.constant 0 : i32
    %c0_i32_1 = arith.constant 0 : i32
    return %c0_i32, %c0_i32_0 : i32, i32
  }
  func.func @transform_4(%arg0: i32, %arg1: i32) -> (i32, i32) {
    %c0_i32 = arith.constant 0 : i32
    %c0_i32_0 = arith.constant 0 : i32
    %c0_i32_1 = arith.constant 0 : i32
    return %c0_i32, %c0_i32_0 : i32, i32
  }
  func.func @transform_5(%arg0: i32, %arg1: i32) -> (i32, i32, i32) {
    %c0_i32 = arith.constant 0 : i32
    %c0_i32_0 = arith.constant 0 : i32
    %c0_i32_1 = arith.constant 0 : i32
    %c0_i32_2 = arith.constant 0 : i32
    return %c0_i32, %c0_i32_0, %c0_i32_1 : i32, i32, i32
  }
  func.func @transform_6(%arg0: i32, %arg1: i32) -> (i32, i32) {
    %c0_i32 = arith.constant 0 : i32
    %c0_i32_0 = arith.constant 0 : i32
    %c0_i32_1 = arith.constant 0 : i32
    return %c0_i32, %c0_i32_0 : i32, i32
  }
  func.func @transform_7(%arg0: i32, %arg1: i32) -> (i32, i32) {
    %c0_i32 = arith.constant 0 : i32
    %c0_i32_0 = arith.constant 0 : i32
    %c0_i32_1 = arith.constant 0 : i32
    return %c0_i32, %c0_i32_0 : i32, i32
  }
  func.func @transform_8(%arg0: i32, %arg1: i32) -> (i32, i32) {
    %c0_i32 = arith.constant 0 : i32
    %c0_i32_0 = arith.constant 0 : i32
    %c0_i32_1 = arith.constant 0 : i32
    return %c0_i32, %c0_i32_0 : i32, i32
  }
  func.func @transform_9(%arg0: i32, %arg1: i32) -> (i32, i32, i32, i32) {
    %c0_i32 = arith.constant 0 : i32
    %c0_i32_0 = arith.constant 0 : i32
    %c0_i32_1 = arith.constant 0 : i32
    return %arg0, %arg1, %c0_i32, %c0_i32_0 : i32, i32, i32, i32
  }
}

</mosaic_0001>

<bundles_post_ra>
// kernel: tpu_custom_call.1
= control target key start
LH: loop header
LB: loop body
LE: loop exit
PB: predicated region body
PF: predicated region fallthrough
CT: control target
= control target key end

     0   :  { %s7497_s0 = inlined_call_operand.hbm [shape: bf16[2,16,16,128], index: 0, kind: input, shape index: {}]   ;;  %s7498_s1 = inlined_call_operand.hbm [shape: bf16[2,16,16,128], index: 1, kind: input, shape index: {}]   ;;  %s7499_s2 = inlined_call_operand.hbm [shape: bf16[2,16,16,128], index: 2, kind: input, shape index: {}]   ;;  %s7500_s3 = inlined_call_operand.hbm [shape: bf16[128,128], index: 3, kind: input, shape index: {}]   ;;  %s7501_s4 = inlined_call_operand.vmem [shape: f32[1,128], index: 4, kind: input, shape index: {}]   ;;  %s7502_s5 = inlined_call_operand.hbm [shape: bf16[9,128,128], index: 5, kind: input, shape index: {}]   ;;  %s7503_s6 = inlined_call_operand.vmem [shape: f32[1,128], index: 6, kind: input, shape index: {}]   ;;  %s7504_s7 = inlined_call_operand.hbm [shape: bf16[128,128], index: 7, kind: input, shape index: {}]   ;;  %s7505_s8 = inlined_call_operand.vmem [shape: f32[1,128], index: 8, kind: input, shape index: {}]   ;;  %s7506_s9 = inlined_call_operand.hbm [shape: bf16[2,16,16,128], index: 9, kind: output, shape index: {}]  }
   0x1   :  { %7533 = sst [smem:[#allocation29_spill]] %s7498_s1 }
   0x2   :  { %7534 = sst [smem:[#allocation30_spill]] %s7500_s3 }
   0x3   :  { %7535 = sst [smem:[#allocation31_spill]] %s7503_s6 }
   0x4   :  { %7536 = sst [smem:[#allocation32_spill]] %s7505_s8 }
   0x5   :  { %7537 = sst [smem:[#allocation33_spill]] %s7506_s9 }
   0x6   :  { %14 = vsyncpa [#allocation4], 0 }
   0x7   :  { %16 = vsyncpa [#allocation4 + $0x1], 0 }
   0x8   :  { %17 = vsyncpa [#allocation7], 0 }
   0x9   :  { %19 = vsyncpa [#allocation7 + $0x1], 0 }
   0xa   :  { %20 = vsyncpa [#allocation10], 0 }
   0xb   :  { %21 = vsyncpa [#allocation13], 0 }
   0xc   :  { %22 = vsyncpa [#allocation5], 0 }
   0xd   :  { %24 = vsyncpa [#allocation5 + $0x1], 0  ;;  %s6292_s30 = smov 0   ;;  %s6294_s10 = smov 0  }
   0xe   :  { %s6296_s11 = smov 0   ;;  %s6298_s12 = smov 0  }
   0xf   :  { %s6300_s13 = smov 0   ;;  %s6302_s14 = smov 0  }
  0x10 LB: > { %7538 = sst [smem:[#allocation20_spill]] %s6206_s30  ;;  %s6323_s15 = sadd.s32 4294967295, %s6226_s14   ;;  %s6226_s14 = sphi %s6302_s14, %s30_s14   ;;  %s6222_s13 = sphi %s6300_s13, %s7586_s13   ;;  %s6218_s12 = sphi %s6298_s12, %s7589_s12   ;;  %s6214_s11 = sphi %s6296_s11, %s7584_s11   ;;  %s6210_s10 = sphi %s6294_s10, %s7588_s10   ;;  %s6206_s30 = sphi %s6292_s30, %s7587_s30  }
  0x11   : > { %7539 = sst [smem:[#allocation21_spill]] %s6214_s11  ;;  %s4319_s16 = sadd.s32 4294967294, %s6226_s14  }
  0x12   : > { %7540 = sst [smem:[#allocation22_spill]] %s6218_s12  ;;  %p58_p0 = scmp.ne.s32.totalorder %s6214_s11, %s6210_s10 }
  0x13   : > { %7541 = sst [smem:[#allocation23_spill]] %s6222_s13  ;;  %p59_p1 = scmp.eq.s32.totalorder %s6226_s14, 0 }
  0x14   : > { %7542 = sst [smem:[#allocation24_spill]] %s6226_s14  ;;  %p64_p2 = scmp.ne.s32.totalorder %s6210_s10, %s6206_s30 }
  0x15   : > { %p7510_p3 = scmp.eq.s32.totalorder %s6323_s15, 0  ;;  %p6332_p4 = por %p59_p1, %p58_p0 }
  0x16   : > { %p288_p5 = scmp.eq.s32.totalorder %s6323_s15, 1  ;;  %p294_p7 = scmp.eq.s32.totalorder %s4319_s16, 1 }
  0x17   : > { %p6339_p6 = por %p7510_p3, %p64_p2  ;;  %p4320_p9 = scmp.ge.s32.totalorder %s6226_s14, 1 }
  0x18   : > { %p6343_p8 = por %p288_p5, %p58_p0  ;;  %p6348_p10 = por %p294_p7, %p64_p2 }
  0x19   : > { %s7544_s18 = scalar_select %p6339_p6, 1, 0 }
  0x1a   : > { %s7545_s19 = scalar_select %p6343_p8, 1, 0 }
  0x1b   : > { %s7547_s20 = scalar_select %p6348_p10, 1, 0 }
  0x1c   : > { %7546 = sst [smem:[#allocation25_spill]] %s7545_s19  ;;  %p301_p11 = scmp.lt.s32.totalorder %s6226_s14, 3 }
  0x1d   : > { %7548 = sst [smem:[#allocation26_spill]] %s7547_s20  ;;  %s6228_s22 = smov [#allocation9]  }
  0x1e   : > { %p6353_p12 = pnand %p4320_p9, %p301_p11  ;;  %s313_s23 = sshll.u32 %s6228_s22, 4  ;;  %s6357_s23 = int_to_ptr.vmem [resolvable:$true] %s313_s23 }
  0x1f   : > { %s42_s25 = sadd.s32 1, %s6222_s13  ;;  %s7552_s3 = sld [smem:[#allocation30_spill]] }
  0x20   : > { %s7549_s21 = scalar_select %p6353_p12, 1, 0 }
  0x21   : > { %p5762_p13 = pneg %p6353_p12  ;;  %p6370_p2 = scmp.ge.s32.totalorder %s42_s25, 2 }
  0x23   : > { %p6364_p1 = pnand %p5762_p13, %p7510_p3 }
  0x25   : > { %s7550_s24 = scalar_select %p6364_p1, 1, 0 }
  0x26   : > { %s5958_s16 = scalar_lea.hbm %s7552_s3, 1024  ;;  %p6382_p7 = pneg %p6364_p1 }
  0x27   : > { %p5959_p5 = scmp.ne.s32.totalorder %s7552_s3, %s5958_s16  ;;  %p5965_p13 = scmp.lt.u32.totalorder %s5958_s16, %s7552_s3 }
  0x28   : > { %s7553_s30 = scalar_select %p6382_p7, 1, 0 }
  0x29   : > { %p5961_p9 = pnand %p6382_p7, %p5959_p5 }
  0x2b   : > { %p5962_p11 = pneg %p5961_p9 }
  0x2d   : > { %p5967_p0 = pnand %p5965_p13, %p5962_p11 }
  0x2f   : > { %5970 = shalt.err (!%p5967_p0)
}
  0x30   : > { %s5971_s20 = scalar_lea.vmem %s6357_s23, 1024  ;;  %p5979_p6 = scmp.lt.s32.totalorder %s6357_s23, %s6357_s23 }
  0x31   : > { %p5972_p3 = scmp.ne.s32.totalorder %s6357_s23, %s5971_s20  ;;  %p5980_p12 = scmp.lt.s32.totalorder %s5971_s20, %s5971_s20 }
  0x33   : > { %p5974_p10 = pnand %p5972_p3, %p6382_p7  ;;  %p5981_p5 = por %p5980_p12, %p5979_p6 }
  0x35   : > { %p5975_p8 = pneg %p5974_p10 }
  0x37   : > { %p5982_p9 = pnand %p5981_p5, %p5975_p8 }
  0x39   : > { %5985 = shalt.err (!%p5982_p9)
}
  0x3a   : > { %s7516_s28 = smov 64   ;;  %s7518_s9 = smov 4  }
  0x3b   : > { %5765 = dma.hbm_to_vmem [thread:$0]  (!%p6364_p1), %s7552_s3, 1024, %s6357_s23, [#allocation10], %s7516_s28, %s7516_s28, %s7518_s9  }
  0x3c   : > { %s7591_s25 = smov (%p6370_p2, %s42_s25), 0  ;;  %p5789_p3 = scmp.lt.s32.totalorder %s6226_s14, 2 }
  0x3d   : > { %7554 = sst [smem:[#allocation27_spill]] %s7591_s25  ;;  %s6412_s16 = sand.u32 1, %s6214_s11  }
  0x3e   : > { %s46_s22 = ssub.s32 %s6222_s13, %s7591_s25  ;;  %s6417_s20 = sshll.u32 %s6222_s13, 11 }
  0x3f   : > { %p49_p6 = scmp.eq.s32.totalorder %s46_s22, 0  ;;  %p6421_p8 = pnand %p5789_p3, %p6332_p4 }
  0x40   : > { %s386_s23 = sand.u32 1, %s6226_s14   ;;  %s4328_s27 = sshll.u32 %s6412_s16, 3 }
  0x41   : > { %s7555_s19 = scalar_select %p6421_p8, 1, 0 }
  0x42   : > { %s7556_s26 = sadd.s32 1, %s6214_s11  ;;  %s7558_s1 = sld [smem:[#allocation29_spill]] }
  0x43   : > { %s6430_s29 = scalar_select %p49_p6, %s6214_s11, %s7556_s26  }
  0x44   : > { %s390_s17 = scalar_lea.vmem [#allocation6], %s4328_s27  ;;  %s6440_s25 = scalar_lea.vmem [#allocation8], %s4328_s27 }
  0x45   : > { %7557 = sst [smem:[#allocation28_spill]] %s6430_s29  ;;  %s403_s22 = sshll.u32 %s390_s17, 4  ;;  %s6438_s22 = int_to_ptr.vmem [resolvable:$true] %s403_s22 }
  0x46   : > { %s430_s13 = sshll.u32 %s6440_s25, 4  ;;  %s6443_s14 = scalar_lea.sflag [#allocation7], %s386_s23  ;;  %s6478_s13 = int_to_ptr.vmem [resolvable:$true] %s430_s13 }
  0x47   : > { %p6449_p10 = pneg %p6421_p8 }
  0x48   : > { %s6436_s3 = scalar_lea.hbm %s7558_s1, %s6417_s20  ;;  %s5991_s27 = scalar_lea.hbm %s7558_s1, 4096 }
  0x49   : > { %s5986_s26 = scalar_lea.hbm %s6436_s3, 128  ;;  %p5992_p2 = scmp.lt.u32.totalorder %s6436_s3, %s7558_s1 }
  0x4a   : > { %p5987_p4 = scmp.ne.s32.totalorder %s6436_s3, %s5986_s26  ;;  %p5993_p11 = scmp.lt.u32.totalorder %s5991_s27, %s5986_s26 }
  0x4b   : > { %s7559_s28 = scalar_select %p6449_p10, 1, 0 }
  0x4c   : > { %p5989_p12 = pnand %p6449_p10, %p5987_p4  ;;  %p5994_p13 = por %p5993_p11, %p5992_p2 }
  0x4d   : > { %p5995_p5 = scmp.lt.u32.totalorder %s5986_s26, %s6436_s3 }
  0x4e   : > { %p5990_p0 = pneg %p5989_p12 }
  0x4f   : > { %p5996_p9 = por %p5995_p5, %p5994_p13 }
  0x51   : > { %p5997_p3 = pnand %p5996_p9, %p5990_p0 }
  0x53   : > { %6000 = shalt.err (!%p5997_p3)
}
  0x54   : > { %s6001_s23 = scalar_lea.vmem %s6438_s22, 128  ;;  %s6231_s9 = smov [#allocation6]  }
  0x55   : > { %p6002_p6 = scmp.ne.s32.totalorder %s6438_s22, %s6001_s23  ;;  %s6006_s17 = sshll.u32 %s6231_s9, 4  ;;  %s6007_s17 = int_to_ptr.vmem [resolvable:$false] %s6006_s17 }
  0x56   : > { %s6008_s11 = scalar_lea.vmem %s6007_s17, 256  ;;  %p6009_p1 = scmp.lt.s32.totalorder %s6438_s22, %s6007_s17 }
  0x57   : > { %p6004_p4 = pnand %p6002_p6, %p6449_p10  ;;  %p6010_p7 = scmp.lt.s32.totalorder %s6008_s11, %s6001_s23 }
  0x59   : > { %p6005_p12 = pneg %p6004_p4  ;;  %p6011_p2 = por %p6010_p7, %p6009_p1 }
  0x5b   : > { %p6012_p11 = pnand %p6011_p2, %p6005_p12 }
  0x5d   : > { %6015 = shalt.err (!%p6012_p11)
}
  0x5e   : > { %s7560_s29 = smov 4   ;;  %s7561_s26 = smov 64  }
  0x5f   : > { %5778 = dma.hbm_to_vmem [thread:$0]  (!%p6421_p8), %s6436_s3, 128, %s6438_s22, %s6443_s14, %s7561_s26, %s7561_s26, %s7560_s29  }
  0x60   : > { %s6232_s27 = smov [#allocation11]   ;;  %s6233_s23 = smov [#allocation12]  }
  0x61   : > { %s329_s9 = sshll.u32 %s6232_s27, 4  ;;  %s345_s17 = sshll.u32 %s6233_s23, 4  ;;  %s330_s9 = int_to_ptr.vmem [resolvable:$true] %s329_s9  ;;  %s346_s17 = int_to_ptr.vmem [resolvable:$true] %s345_s17 }
  0x62   : > { %s6016_s12 = scalar_lea.hbm %s7502_s5, 9216  ;;  %p7562_p7 = scmp.ne.s32.totalorder %s7553_s30, 0 }
  0x63   : > { %p6017_p1 = scmp.ne.s32.totalorder %s7502_s5, %s6016_s12  ;;  %p6023_p5 = scmp.lt.u32.totalorder %s6016_s12, %s7502_s5 }
  0x65   : > { %p6019_p0 = pnand %p6017_p1, %p7562_p7 }
  0x67   : > { %p6020_p13 = pneg %p6019_p0 }
  0x69   : > { %p6025_p9 = pnand %p6023_p5, %p6020_p13 }
  0x6b   : > { %6028 = shalt.err (!%p6025_p9)
}
  0x6c   : > { %s6029_s22 = scalar_lea.vmem %s330_s9, 9216  ;;  %p6037_p12 = scmp.lt.s32.totalorder %s330_s9, %s330_s9 }
  0x6d   : > { %p6030_p3 = scmp.ne.s32.totalorder %s330_s9, %s6029_s22  ;;  %p6038_p2 = scmp.lt.s32.totalorder %s6029_s22, %s6029_s22 }
  0x6f   : > { %p6032_p6 = pnand %p6030_p3, %p7562_p7  ;;  %p6039_p11 = por %p6038_p2, %p6037_p12 }
  0x71   : > { %p6033_p4 = pneg %p6032_p6 }
  0x73   : > { %p6040_p8 = pnand %p6039_p11, %p6033_p4 }
  0x75   : > { %6043 = shalt.err (!%p6040_p8)
}
  0x76   : > { %p7563_p1 = scmp.ne.s32.totalorder %s7550_s24, 0  ;;  %s6044_s27 = scalar_lea.hbm %s7504_s7, 1024 }
  0x77   : > { %p6045_p0 = scmp.ne.s32.totalorder %s7504_s7, %s6044_s27  ;;  %p6051_p5 = scmp.lt.u32.totalorder %s6044_s27, %s7504_s7 }
  0x78   : > { %5768 = dma.hbm_to_vmem [thread:$0]  (!%p7563_p1), %s7502_s5, 9216, %s330_s9, [#allocation10], %s7561_s26, %s7561_s26, %s7560_s29  }
  0x79   : > { %p6047_p8 = pnand %p6045_p0, %p7562_p7 }
  0x7b   : > { %p6048_p13 = pneg %p6047_p8 }
  0x7d   : > { %p6053_p9 = pnand %p6051_p5, %p6048_p13 }
  0x7f   : > { %6056 = shalt.err (!%p6053_p9)
}
  0x80   : > { %s6057_s22 = scalar_lea.vmem %s346_s17, 1024  ;;  %p6065_p12 = scmp.lt.s32.totalorder %s346_s17, %s346_s17 }
  0x81   : > { %p6058_p3 = scmp.ne.s32.totalorder %s346_s17, %s6057_s22  ;;  %p6066_p2 = scmp.lt.s32.totalorder %s6057_s22, %s6057_s22 }
  0x83   : > { %p6060_p6 = pnand %p6058_p3, %p7562_p7  ;;  %p6067_p11 = por %p6066_p2, %p6065_p12 }
  0x85   : > { %p6061_p4 = pneg %p6060_p6 }
  0x87   : > { %p6068_p10 = pnand %p6067_p11, %p6061_p4 }
  0x89   : > { %6071 = shalt.err (!%p6068_p10)
}
  0x8a   : > { %5771 = dma.hbm_to_vmem [thread:$0]  (!%p7563_p1), %s7504_s7, 1024, %s346_s17, [#allocation13], %s7561_s26, %s7561_s26, %s7560_s29  }
  0x8b   : > { %s4325_s30 = sshll.u32 %s6412_s16, 7  ;;  %s6527_s12 = scalar_lea.hbm %s7497_s0, %s6417_s20 }
  0x8c   : > { %s4491_s24 = sadd.s32 1920, %s6417_s20  ;;  %s366_s27 = scalar_lea.vmem [#allocation3], %s4325_s30 }
  0x8d   : > { %s376_s23 = sshll.u32 %s366_s27, 4  ;;  %s6533_s25 = scalar_lea.hbm %s7499_s2, %s4491_s24  ;;  %s6535_s23 = int_to_ptr.vmem [resolvable:$true] %s376_s23 }
  0x8e   : > { %s363_s17 = scalar_lea.sflag [#allocation4], %s6412_s16  ;;  %s6072_s22 = scalar_lea.hbm %s6527_s12, 2048 }
  0x8f   : > { %p6073_p10 = scmp.ne.s32.totalorder %s6527_s12, %s6072_s22  ;;  %p7564_p7 = scmp.ne.s32.totalorder %s7559_s28, 0 }
  0x90   : > { %s6077_s6 = scalar_lea.hbm %s7497_s0, 4096  ;;  %p6078_p8 = scmp.lt.u32.totalorder %s6527_s12, %s7497_s0 }
  0x91   : > { %p6075_p1 = pnand %p6073_p10, %p7564_p7  ;;  %p6079_p13 = scmp.lt.u32.totalorder %s6077_s6, %s6072_s22 }
  0x92   : > { %p6081_p9 = scmp.lt.u32.totalorder %s6072_s22, %s6527_s12 }
  0x93   : > { %p6076_p0 = pneg %p6075_p1  ;;  %p6080_p5 = por %p6079_p13, %p6078_p8 }
  0x95   : > { %p6082_p3 = por %p6081_p9, %p6080_p5 }
  0x97   : > { %p6083_p6 = pnand %p6082_p3, %p6076_p0 }
  0x99   : > { %6086 = shalt.err (!%p6083_p6)
}
  0x9a   : > { %s6087_s8 = scalar_lea.vmem %s6535_s23, 2048  ;;  %s6234_s24 = smov [#allocation3]  }
  0x9b   : > { %p6088_p4 = scmp.ne.s32.totalorder %s6535_s23, %s6087_s8  ;;  %s6092_s27 = sshll.u32 %s6234_s24, 4  ;;  %s6093_s27 = int_to_ptr.vmem [resolvable:$false] %s6092_s27 }
  0x9c   : > { %s6094_s11 = scalar_lea.vmem %s6093_s27, 4096  ;;  %p6095_p11 = scmp.lt.s32.totalorder %s6535_s23, %s6093_s27 }
  0x9d   : > { %p6090_p12 = pnand %p6088_p4, %p7564_p7  ;;  %p6096_p10 = scmp.lt.s32.totalorder %s6094_s11, %s6087_s8 }
  0x9f   : > { %p6091_p2 = pneg %p6090_p12  ;;  %p6097_p1 = por %p6096_p10, %p6095_p11 }
  0xa1   : > { %p6098_p8 = pnand %p6097_p1, %p6091_p2 }
  0xa3   : > { %6101 = shalt.err (!%p6098_p8)
}
  0xa4   : > { %p7565_p0 = scmp.ne.s32.totalorder %s7555_s19, 0  ;;  %s6102_s3 = scalar_lea.hbm %s6533_s25, 128 }
  0xa5   : > { %p6103_p13 = scmp.ne.s32.totalorder %s6533_s25, %s6102_s3  ;;  %s6107_s1 = scalar_lea.hbm %s7499_s2, 4096 }
  0xa6   : > { %5775 = dma.hbm_to_vmem [thread:$0]  (!%p7565_p0), %s6527_s12, 2048, %s6535_s23, %s363_s17, %s7561_s26, %s7561_s26, %s7560_s29  }
  0xa7   : > { %p6105_p5 = pnand %p6103_p13, %p7564_p7  ;;  %p6108_p3 = scmp.lt.u32.totalorder %s6533_s25, %s7499_s2 }
  0xa8   : > { %p6109_p6 = scmp.lt.u32.totalorder %s6107_s1, %s6102_s3  ;;  %p6111_p12 = scmp.lt.u32.totalorder %s6102_s3, %s6533_s25 }
  0xa9   : > { %p6106_p9 = pneg %p6105_p5 }
  0xaa   : > { %p6110_p4 = por %p6109_p6, %p6108_p3 }
  0xac   : > { %p6112_p2 = por %p6111_p12, %p6110_p4 }
  0xae   : > { %p6113_p11 = pnand %p6112_p2, %p6106_p9 }
  0xb0   : > { %6116 = shalt.err (!%p6113_p11)
}
  0xb1   : > { %s6117_s16 = scalar_lea.vmem %s6478_s13, 128  ;;  %s6235_s12 = smov [#allocation8]  }
  0xb2   : > { %p6118_p10 = scmp.ne.s32.totalorder %s6478_s13, %s6117_s16  ;;  %s6122_s23 = sshll.u32 %s6235_s12, 4  ;;  %s6123_s23 = int_to_ptr.vmem [resolvable:$false] %s6122_s23 }
  0xb3   : > { %s6124_s17 = scalar_lea.vmem %s6123_s23, 256  ;;  %p6125_p13 = scmp.lt.s32.totalorder %s6478_s13, %s6123_s23 }
  0xb4   : > { %p6120_p1 = pnand %p6118_p10, %p7564_p7  ;;  %p6126_p5 = scmp.lt.s32.totalorder %s6124_s17, %s6117_s16 }
  0xb6   : > { %p6121_p8 = pneg %p6120_p1  ;;  %p6127_p3 = por %p6126_p5, %p6125_p13 }
  0xb8   : > { %p6128_p6 = pnand %p6127_p3, %p6121_p8 }
  0xba   : > { %6131 = shalt.err (!%p6128_p6)
}
  0xbb   : > { %5781 = dma.hbm_to_vmem [thread:$0]  (!%p7565_p0), %s6533_s25, 128, %s6478_s13, %s6443_s14, %s7561_s26, %s7561_s26, %s7560_s29  }
  0xbc   : > { %p7566_p7 = scmp.ne.s32.totalorder %s7549_s21, 0 }
  0xbd   : > { %s6592_s28 = sand.u32 (!%p7566_p7), 1, %s6210_s10   ;;  %p7567_p9 = scmp.ne.s32.totalorder (!%p7566_p7), %s7544_s18, 0 }
  0xbe   : > { %442 = sbr.rel (%p7566_p7) target bundleno = 1309 (0x51d), region = 56  ;;  %s4335_s30 = sshll.u32 (!%p7566_p7), %s6592_s28, 7 }
  0xbf   : > { %s445_s8 = scalar_lea.sflag (!%p7566_p7), [#allocation4], %s6592_s28  ;;  %s6598_s19 = scalar_lea.vmem (!%p7566_p7), [#allocation3], %s4335_s30 }
  0xc5   : > { %6185 = dma.done.wait (%p7567_p9), %s445_s8, 2048  }
  0xc6   : > { %6187 = vsyncadd (%p7567_p9), %s445_s8, 4294965248  ;;  %s453_s13 = sand.u32 1, %s6323_s15   ;;  %s4336_s14 = sshll.u32 %s6592_s28, 3 }
  0xc7   : > { %s454_s21 = scalar_lea.sflag [#allocation7], %s453_s13  ;;  %s6606_s29 = scalar_lea.vmem [#allocation6], %s4336_s14 }
  0xc8   : > { %6189 = dma.done.wait (%p7567_p9), %s454_s21, 256  }
  0xc9   : > { %6191 = vsyncadd (%p7567_p9), %s454_s21, 4294967040  ;;  %s6612_s26 = scalar_lea.vmem [#allocation8], %s4336_s14  ;;  %p7568_p0 = scmp.eq.s32.totalorder %s6323_s15, 0 }
  0xcb   : > { %6193 = dma.done.wait (%p7568_p0), [#allocation10], 10240   ;;  %p7569_p4 = pmov %p7568_p0 }
  0xcc   : > { %p7570_p12 = pmov %p7568_p0 }
  0xcd   : > { %6195 = vsyncadd (%p7569_p4), [#allocation10], 4294957056 }
  0xce   : > { %6197 = dma.done.wait (%p7570_p12), [#allocation13], 1024   ;;  %p7571_p2 = pmov %p7568_p0 }
  0xcf   : > { %v6622_v0 = vld [vmem:[#allocation9] sm:$0xff]   ;;  %v6624_v1 = vld [vmem:[#allocation9 + $0x8] sm:$0xff]   ;;  %v6629_v2 = vld [vmem:[#allocation9 + $0x10] sm:$0xff]   ;;  %v6236_v14 = vmov 0.0   ;;  %vm6237_vm0 = vmmov 0   ;;  %s7572_s27 = sld [smem:[#allocation31_spill]] }
  0xd0   : > { %6199 = vsyncadd (%p7571_p2), [#allocation13], 4294966272  ;;  %4982 = vmatprep.subr.bf16.mxu1 %v6622_v0  ;;  %v6632_v3 = vld [vmem:[#allocation9 + $0x18] sm:$0xff]   ;;  %v5860_v4 = vld [vmem:[%s6598_s19] sm:$0xff]   ;;  %s7573_s22 = sld [smem:[#allocation32_spill]]  ;;  %s7385_s9 = scalar_lea.vmem [#allocation14], %s4335_s30 }
  0xd1   : > { %4983 = vmatpush3.bf16.msra.mxu1 %v6622_v0  ;;  %4998 = vmatprep.mubr.bf16.mxu1 %v5860_v4  ;;  %v6638_v5 = vld [vmem:[#allocation9 + $0x20] sm:$0xff]   ;;  %v6642_v6 = vld [vmem:[#allocation9 + $0x28] sm:$0xff]   ;;  %v6646_v7 = vld [vmem:[#allocation9 + $0x30] sm:$0xff]   ;;  %s7574_s1 = sld [smem:[#allocation22_spill]]  ;;  %s7575_s6 = sld [smem:[#allocation25_spill]] }
  0xd2   : > { %4984 = vmatprep.subr.bf16.mxu1 %v6624_v1  ;;  %v6650_v8 = vld [vmem:[#allocation9 + $0x38] sm:$0xff]   ;;  %v5877_v9 = vld [vmem:[#allocation11 + $0xc0] sm:$0xff]   ;;  %v5880_v10 = vld [vmem:[#allocation11 + $0xc8] sm:$0xff]   ;;  %s4153_s16 = sshll.u32 %s7385_s9, 4  ;;  %s7576_s17 = sld [smem:[#allocation33_spill]]  ;;  %s7446_s16 = int_to_ptr.vmem [resolvable:$true] %s4153_s16 }
  0xd3   : > { %5070 = vmatprep.subr.bf16.mxu0 %v5877_v9  ;;  %v5861_v11 = vld [vmem:[%s6598_s19 + $0x8] sm:$0xff]   ;;  %v5882_v12 = vld [vmem:[#allocation11 + $0xd0] sm:$0xff]   ;;  %v5884_v15 = vld [vmem:[#allocation11 + $0xd8] sm:$0xff]   ;;  %s4137_s8 = scalar_lea.sflag [#allocation5], %s6592_s28  ;;  %s6239_s13 = smov [#allocation14]  }
  0xd4   : > { %5071 = vmatpush3.bf16.msra.mxu0 %v5877_v9  ;;  %v5862_v13 = vld [vmem:[%s6598_s19 + $0x10] sm:$0xff]   ;;  %v5863_v16 = vld [vmem:[%s6598_s19 + $0x18] sm:$0xff]   ;;  %v5864_v17 = vld [vmem:[%s6598_s19 + $0x20] sm:$0xff]   ;;  %s6136_s14 = sshll.u32 %s6239_s13, 4  ;;  %s6137_s14 = int_to_ptr.vmem [resolvable:$false] %s6136_s14 }
  0xd5   : > { %4985 = vmatpush3.bf16.msra.mxu1 %v6624_v1  ;;  %5072 = vmatprep.subr.bf16.mxu0 %v5880_v10  ;;  %v5886_v18 = vld [vmem:[#allocation11 + $0xe0] sm:$0xff]   ;;  %v5888_v19 = vld [vmem:[#allocation11 + $0xe8] sm:$0xff]   ;;  %v5866_v21 = vld [vmem:[%s6598_s19 + $0x30] sm:$0xff]   ;;  %s6138_s21 = scalar_lea.vmem %s6137_s14, 4096  ;;  %p6139_p13 = scmp.lt.s32.totalorder %s7446_s16, %s6137_s14 }
  0xd6   : > { %4986 = vmatprep.subr.bf16.mxu1 %v6629_v2  ;;  %v5865_v20 = vld [vmem:[%s6598_s19 + $0x28] sm:$0xff]   ;;  %v5867_v22 = vld [vmem:[%s6598_s19 + $0x38] sm:$0xff]   ;;  %v5868_v23 = vld [vmem:[%s6598_s19 + $0x40] sm:$0xff]  }
  0xd7   : > { %v5869_v24 = vld [vmem:[%s6598_s19 + $0x48] sm:$0xff]   ;;  %v5870_v25 = vld [vmem:[%s6598_s19 + $0x50] sm:$0xff]   ;;  %v5871_v26 = vld [vmem:[%s6598_s19 + $0x58] sm:$0xff]   ;;  %s4524_s20 = sshll.u32 %s7574_s1, 11  ;;  %p7577_p10 = scmp.ne.s32.totalorder %s7575_s6, 0 }
  0xd8   : > { %5073 = vmatpush3.bf16.msra.mxu0 %v5880_v10  ;;  %v5872_v27 = vld [vmem:[%s6598_s19 + $0x60] sm:$0xff]   ;;  %v5873_v28 = vld [vmem:[%s6598_s19 + $0x68] sm:$0xff]   ;;  %v5874_v29 = vld [vmem:[%s6598_s19 + $0x70] sm:$0xff]   ;;  %s7444_s30 = scalar_lea.hbm %s7576_s17, %s4524_s20 }
  0xd9   : > { %4987 = vmatpush3.bf16.msra.mxu1 %v6629_v2  ;;  %5074 = vmatprep.subr.bf16.mxu0 %v5882_v12  ;;  %v5875_v30 = vld [vmem:[%s6598_s19 + $0x78] sm:$0xff]   ;;  %v5876_v31 = vld [vmem:[%s6606_s29] sm:$0xff]   ;;  %v5890_v32 = vld [vmem:[#allocation11 + $0xf0] sm:$0xff]  }
  0xda   : > { %4988 = vmatprep.subr.bf16.mxu1 %v6632_v3  ;;  %v5892_v33 = vld [vmem:[#allocation11 + $0xf8] sm:$0xff]   ;;  %v5878_v34 = vld [vmem:[#allocation11 + $0x100] sm:$0xff]   ;;  %v5881_v36 = vld [vmem:[#allocation11 + $0x108] sm:$0xff]  }
  0xdb   : > { %v5879_v35 = vld [vmem:[%s6612_s26] sm:$0xff]   ;;  %v5894_v38 = vld [vmem:[#allocation11] sm:$0xff]   ;;  %v5889_v41 = vld [vmem:[#allocation11 + $0x128] sm:$0xff]  }
  0xdc   : > { %5075 = vmatpush3.bf16.msra.mxu0 %v5882_v12  ;;  %v5883_v37 = vld [vmem:[#allocation11 + $0x110] sm:$0xff]   ;;  %v5885_v39 = vld [vmem:[#allocation11 + $0x118] sm:$0xff]   ;;  %v5887_v40 = vld [vmem:[#allocation11 + $0x120] sm:$0xff]  }
  0xdd   : > { %4989 = vmatpush3.bf16.msra.mxu1 %v6632_v3  ;;  %5076 = vmatprep.subr.bf16.mxu0 %v5884_v15  ;;  %v5891_v42 = vld [vmem:[#allocation11 + $0x130] sm:$0xff]   ;;  %v5893_v43 = vld [vmem:[#allocation11 + $0x138] sm:$0xff]   ;;  %v5899_v44 = vld [vmem:[#allocation11 + $0x40] sm:$0xff]  }
  0xde   : > { %4990 = vmatprep.subr.bf16.mxu1 %v6638_v5  ;;  %v6709_v45 = vld [vmem:[%s7501_s4] ss:$0 sm:$0xff]  ;;  %v5895_v63 = vld [vmem:[#allocation11 + $0x8] sm:$0xff]   ;;  %v5902_v9 = vld [vmem:[#allocation11 + $0x50] sm:$0xff]  }
  0xe0   : > { %5077 = vmatpush3.bf16.msra.mxu0 %v5884_v15 }
  0xe1   : > { %4991 = vmatpush3.bf16.msra.mxu1 %v6638_v5  ;;  %5078 = vmatprep.subr.bf16.mxu0 %v5886_v18 }
  0xe2   : > { %4992 = vmatprep.subr.bf16.mxu1 %v6642_v6 }
  0xe4   : > { %5079 = vmatpush3.bf16.msra.mxu0 %v5886_v18  ;;  %v5903_v18 = vld [vmem:[#allocation11 + $0x58] sm:$0xff]  }
  0xe5   : > { %4993 = vmatpush3.bf16.msra.mxu1 %v6642_v6  ;;  %5080 = vmatprep.subr.bf16.mxu0 %v5888_v19 }
  0xe6   : > { %4994 = vmatprep.subr.bf16.mxu1 %v6646_v7 }
  0xe8   : > { %5081 = vmatpush3.bf16.msra.mxu0 %v5888_v19 }
  0xe9   : > { %4995 = vmatpush3.bf16.msra.mxu1 %v6646_v7  ;;  %5082 = vmatprep.subr.bf16.mxu0 %v5890_v32 }
  0xea   : > { %4996 = vmatprep.subr.bf16.mxu1 %v6650_v8 }
  0xec   : > { %5083 = vmatpush3.bf16.msra.mxu0 %v5890_v32 }
  0xed   : > { %4997 = vmatpush3.bf16.msra.mxu1 %v6650_v8  ;;  %5084 = vmatprep.subr.bf16.mxu0 %v5892_v33 }
  0xee   : > { %5030 = vmatprep.subr.bf16.mxu1 %v6236_v14 }
  0xf0   : > { %4999 = vmatmul.mubr.bf16.vlgmr.msra.gmra.mrb[0].mxu1 %v5861_v11  ;;  %5085 = vmatpush3.bf16.msra.mxu0 %v5892_v33 }
  0xf1   : > { %5002 = vmatprep.mubr.bf16.mxu1 %v5862_v13  ;;  %5031 = vmatpush3.bf16.msra.mxu1 %v6622_v0 }
  0xf2   : > { %5032 = vmatprep.subr.bf16.mxu1 %v6236_v14  ;;  %5118 = vmatprep.subr.bf16.mxu0 %v5894_v38 }
  0xf5   : > { %5033 = vmatpush3.bf16.msra.mxu1 %v6624_v1 }
  0xf6   : > { %5034 = vmatprep.subr.bf16.mxu1 %v6236_v14 }
  0xf8   : > { %5003 = vmatmul.mubr.bf16.gmra.mrb[4].mxu1 %v5863_v16 }
  0xf9   : > { %5006 = vmatprep.mubr.bf16.mxu1 %v5864_v17  ;;  %5035 = vmatpush3.bf16.msra.mxu1 %v6629_v2  ;;  %v5897_v17 = vld [vmem:[#allocation11 + $0x18] sm:$0xff]  }
  0xfa   : > { %5036 = vmatprep.subr.bf16.mxu1 %v6236_v14 }
  0xfd   : > { %5037 = vmatpush3.bf16.msra.mxu1 %v6632_v3 }
  0xfe   : > { %5038 = vmatprep.subr.bf16.mxu1 %v6236_v14 }
 0x100   : > { %5007 = vmatmul.mubr.bf16.gmra.mrb[8].mxu1 %v5865_v20 }
 0x101   : > { %5010 = vmatprep.mubr.bf16.mxu1 %v5866_v21  ;;  %5039 = vmatpush3.bf16.msra.mxu1 %v6638_v5 }
 0x102   : > { %5040 = vmatprep.subr.bf16.mxu1 %v6236_v14 }
 0x105   : > { %5041 = vmatpush3.bf16.msra.mxu1 %v6642_v6 }
 0x106   : > { %5042 = vmatprep.subr.bf16.mxu1 %v6236_v14 }
 0x108   : > { %5011 = vmatmul.mubr.bf16.gmra.mrb[12].mxu1 %v5867_v22 }
 0x109   : > { %5014 = vmatprep.mubr.bf16.mxu1 %v5868_v23  ;;  %5043 = vmatpush3.bf16.msra.mxu1 %v6646_v7 }
 0x10a   : > { %5044 = vmatprep.subr.bf16.mxu1 %v6236_v14 }
 0x10d   : > { %5045 = vmatpush3.bf16.msra.mxu1 %v6650_v8 }
 0x10e   : > { %5050 = vmatprep.subr.bf16.mxu1 %v6236_v14 }
 0x110   : > { %5015 = vmatmul.mubr.bf16.gmra.mrb[16].mxu1 %v5869_v24 }
 0x111   : > { %5018 = vmatprep.mubr.bf16.mxu1 %v5870_v25 }
 0x118   : > { %5019 = vmatmul.mubr.bf16.gmra.mrb[20].mxu1 %v5871_v26  ;;  %v5898_v26 = vld [vmem:[#allocation11 + $0x20] sm:$0xff]  }
 0x119   : > { %5022 = vmatprep.mubr.bf16.mxu1 %v5872_v27  ;;  %v5905_v27 = vld [vmem:[#allocation11 + $0x60] sm:$0xff]  }
 0x120   : > { %5023 = vmatmul.mubr.bf16.gmra.mrb[24].mxu1 %v5873_v28 }
 0x121   : > { %5026 = vmatprep.mubr.bf16.mxu1 %v5874_v29 }
 0x128   : > { %5027 = vmatmul.mubr.bf16.gmra.mrb[28].mxu1 %v5875_v30 }
 0x129   : > { %5046 = vmatprep.mubr.msk.bf16.mxu1 %vm6237_vm0, %v6236_v14 }
 0x130   : > { %5047 = vmatmul.mubr.bf16.vlgmr.msra.gmra.mrb[32].mxu1 %v5876_v31 }
 0x131   : > { %5051 = vmatpush3.bf16.msra.mxu1 %v6622_v0  ;;  %5066 = vmatprep.mubr.msk.bf16.mxu1 %vm6237_vm0, %v6236_v14  ;;  %v5900_v0 = vld [vmem:[#allocation11 + $0x48] sm:$0xff]  }
 0x132   : > { %5052 = vmatprep.subr.bf16.mxu1 %v6236_v14 }
 0x135   : > { %5053 = vmatpush3.bf16.msra.mxu1 %v6624_v1 }
 0x136   : > { %5054 = vmatprep.subr.bf16.mxu1 %v6236_v14 }
 0x139   : > { %5055 = vmatpush3.bf16.msra.mxu1 %v6629_v2 }
 0x13a   : > { %5056 = vmatprep.subr.bf16.mxu1 %v6236_v14 }
 0x13d   : > { %5057 = vmatpush3.bf16.msra.mxu1 %v6632_v3 }
 0x13e   : > { %5058 = vmatprep.subr.bf16.mxu1 %v6236_v14 }
 0x141   : > { %5059 = vmatpush3.bf16.msra.mxu1 %v6638_v5 }
 0x142   : > { %5060 = vmatprep.subr.bf16.mxu1 %v6236_v14 }
 0x145   : > { %5061 = vmatpush3.bf16.msra.mxu1 %v6642_v6 }
 0x146   : > { %5062 = vmatprep.subr.bf16.mxu1 %v6236_v14 }
 0x149   : > { %5063 = vmatpush3.bf16.msra.mxu1 %v6646_v7 }
 0x14a   : > { %5064 = vmatprep.subr.bf16.mxu1 %v6236_v14 }
 0x14d   : > { %5065 = vmatpush3.bf16.msra.mxu1 %v6650_v8  ;;  %v5896_v8 = vld [vmem:[#allocation11 + $0x10] sm:$0xff]  }
 0x14e   : > { %5166 = vmatprep.subr.bf16.mxu1 %v5878_v34 }
 0x150   : > { %5067 = vmatmul.mubr.bf16.vlgmr.msra.gmra.mrb[36].mxu1 %v5879_v35  ;;  %v5901_v35 = vld [vmem:[#allocation11 + $0x28] sm:$0xff]  }
 0x151   : > { %5167 = vmatpush3.bf16.msra.mxu1 %v5878_v34 }
 0x152   : > { %5168 = vmatprep.subr.bf16.mxu1 %v5881_v36 }
 0x155   : > { %5169 = vmatpush3.bf16.msra.mxu1 %v5881_v36  ;;  %v5906_v36 = vld [vmem:[#allocation11 + $0x68] sm:$0xff]  }
 0x156   : > { %5170 = vmatprep.subr.bf16.mxu1 %v5883_v37 }
 0x159   : > { %5171 = vmatpush3.bf16.msra.mxu1 %v5883_v37 }
 0x15a   : > { %5172 = vmatprep.subr.bf16.mxu1 %v5885_v39 }
 0x15d   : > { %5173 = vmatpush3.bf16.msra.mxu1 %v5885_v39 }
 0x15e   : > { %5174 = vmatprep.subr.bf16.mxu1 %v5887_v40 }
 0x161   : > { %5175 = vmatpush3.bf16.msra.mxu1 %v5887_v40 }
 0x162   : > { %5176 = vmatprep.subr.bf16.mxu1 %v5889_v41 }
 0x165   : > { %5177 = vmatpush3.bf16.msra.mxu1 %v5889_v41 }
 0x166   : > { %5178 = vmatprep.subr.bf16.mxu1 %v5891_v42 }
 0x169   : > { %5179 = vmatpush3.bf16.msra.mxu1 %v5891_v42 }
 0x16a   : > { %5180 = vmatprep.subr.bf16.mxu1 %v5893_v43 }
 0x16d   : > { %5181 = vmatpush3.bf16.msra.mxu1 %v5893_v43 }
 0x16e   : > { %5214 = vmatprep.subr.bf16.mxu1 %v5899_v44 }
 0x1c3   : > { %v5000_v46 = vpop.f32.mrb[0].mxu1 }
 0x1c4   : > { %v776_v47 = vadd.f32 %v5000_v46, %v6709_v45  ;;  %v767_v48 = vpop.f32.mrb[1].mxu1  ;;  %v5908_v46 = vld [vmem:[#allocation11 + $0x70] sm:$0xff]  }
 0x1c5   : > { %v768_v49 = vadd.f32 %v6709_v45, %v767_v48  ;;  %v5001_v50 = vpop.f32.mrb[2].mxu1 }
 0x1c6   : > { %v779_v51 = vadd.f32 %v5001_v50, %v6709_v45  ;;  %v770_v52 = vpop.f32.mrb[3].mxu1  ;;  %v896_v54 = vmax.f32 %v776_v47, 0.0 }
 0x1c7   : > { %v771_v53 = vadd.f32 %v6709_v45, %v770_v52  ;;  %v894_v56 = vmax.f32 %v768_v49, 0.0 }
 0x1c8   : > { %v897_v55 = vmax.f32 %v779_v51, 0.0 }
 0x1c9   : > { %v895_v57 = vmax.f32 %v771_v53, 0.0 }
 0x1ca   : > { %v6715_v58 = vpack.c.bf16 %v897_v55, %v896_v54  ;;  %v5907_v54 = vld [vmem:[#allocation11 + $0x38] sm:$0xff]  }
 0x1cb   : > { %v6717_v59 = vpack.c.bf16 %v895_v57, %v894_v56  ;;  %v5004_v60 = vpop.f32.mrb[4].mxu1  ;;  %v5909_v55 = vld [vmem:[#allocation11 + $0x78] sm:$0xff]  }
 0x1cc   : > { %v792_v61 = vadd.f32 %v5004_v60, %v6709_v45  ;;  %v783_v62 = vpop.f32.mrb[5].mxu1 }
 0x1cd   : > { %v784_v1 = vadd.f32 %v6709_v45, %v783_v62  ;;  %v5005_v2 = vpop.f32.mrb[6].mxu1  ;;  %5086 = vmatprep.mubr.bf16.mxu0 %v6717_v59  ;;  %5182 = vmatprep.mubr.bf16.mxu1 %v6717_v59 }
 0x1ce   : > { %v795_v3 = vadd.f32 %v5005_v2, %v6709_v45  ;;  %v786_v4 = vpop.f32.mrb[7].mxu1  ;;  %5087 = vmatmul.mubr.bf16.vlgmr.msra.gmra.mrb[0].mxu0 %v6715_v58  ;;  %5183 = vmatmul.mubr.bf16.vlgmr.msra.gmra.mrb[40].mxu1 %v6715_v58  ;;  %v900_v6 = vmax.f32 %v792_v61, 0.0  ;;  %v6765_v2 = vld [vmem:[#allocation11 + $0x1c0] sm:$0xff]  }
 0x1cf   : > { %v787_v5 = vadd.f32 %v6709_v45, %v786_v4  ;;  %5119 = vmatpush3.bf16.msra.mxu0 %v5894_v38  ;;  %5215 = vmatpush3.bf16.msra.mxu1 %v5899_v44  ;;  %v898_v10 = vmax.f32 %v784_v1, 0.0  ;;  %v5904_v44 = vld [vmem:[#allocation11 + $0x30] sm:$0xff]   ;;  %v6763_v1 = vld [vmem:[#allocation11 + $0x140] sm:$0xff]  }
 0x1d0   : > { %v901_v7 = vmax.f32 %v795_v3, 0.0  ;;  %5120 = vmatprep.subr.bf16.mxu0 %v5895_v63  ;;  %5216 = vmatprep.subr.bf16.mxu1 %v5900_v0 }
 0x1d1   : > { %v899_v11 = vmax.f32 %v787_v5, 0.0 }
 0x1d2   : > { %v6727_v12 = vpack.c.bf16 %v901_v7, %v900_v6 }
 0x1d3   : > { %v6729_v13 = vpack.c.bf16 %v899_v11, %v898_v10  ;;  %v5008_v14 = vpop.f32.mrb[8].mxu1  ;;  %5121 = vmatpush3.bf16.msra.mxu0 %v5895_v63  ;;  %5217 = vmatpush3.bf16.msra.mxu1 %v5900_v0 }
 0x1d4   : > { %v808_v15 = vadd.f32 %v5008_v14, %v6709_v45  ;;  %v799_v16 = vpop.f32.mrb[9].mxu1  ;;  %5122 = vmatprep.subr.bf16.mxu0 %v5896_v8  ;;  %5218 = vmatprep.subr.bf16.mxu1 %v5902_v9 }
 0x1d5   : > { %v800_v19 = vadd.f32 %v6709_v45, %v799_v16  ;;  %v5009_v20 = vpop.f32.mrb[10].mxu1  ;;  %5090 = vmatprep.mubr.bf16.mxu0 %v6729_v13  ;;  %5186 = vmatprep.mubr.bf16.mxu1 %v6729_v13 }
 0x1d6   : > { %v811_v21 = vadd.f32 %v5009_v20, %v6709_v45  ;;  %v802_v22 = vpop.f32.mrb[11].mxu1  ;;  %5091 = vmatmul.mubr.bf16.gmra.mrb[4].mxu0 %v6727_v12  ;;  %5187 = vmatmul.mubr.bf16.gmra.mrb[44].mxu1 %v6727_v12  ;;  %v904_v24 = vmax.f32 %v808_v15, 0.0 }
 0x1d7   : > { %v803_v23 = vadd.f32 %v6709_v45, %v802_v22  ;;  %5123 = vmatpush3.bf16.msra.mxu0 %v5896_v8  ;;  %5219 = vmatpush3.bf16.msra.mxu1 %v5902_v9  ;;  %v902_v28 = vmax.f32 %v800_v19, 0.0 }
 0x1d8   : > { %v905_v25 = vmax.f32 %v811_v21, 0.0  ;;  %5124 = vmatprep.subr.bf16.mxu0 %v5897_v17  ;;  %5220 = vmatprep.subr.bf16.mxu1 %v5903_v18 }
 0x1d9   : > { %v903_v29 = vmax.f32 %v803_v23, 0.0 }
 0x1da   : > { %v6739_v30 = vpack.c.bf16 %v905_v25, %v904_v24 }
 0x1db   : > { %v6741_v31 = vpack.c.bf16 %v903_v29, %v902_v28  ;;  %v5012_v32 = vpop.f32.mrb[12].mxu1  ;;  %5125 = vmatpush3.bf16.msra.mxu0 %v5897_v17  ;;  %5221 = vmatpush3.bf16.msra.mxu1 %v5903_v18 }
 0x1dc   : > { %v824_v33 = vadd.f32 %v5012_v32, %v6709_v45  ;;  %v815_v34 = vpop.f32.mrb[13].mxu1  ;;  %5126 = vmatprep.subr.bf16.mxu0 %v5898_v26  ;;  %5222 = vmatprep.subr.bf16.mxu1 %v5905_v27 }
 0x1dd   : > { %v816_v37 = vadd.f32 %v6709_v45, %v815_v34  ;;  %v5013_v38 = vpop.f32.mrb[14].mxu1  ;;  %5094 = vmatprep.mubr.bf16.mxu0 %v6741_v31  ;;  %5190 = vmatprep.mubr.bf16.mxu1 %v6741_v31 }
 0x1de   : > { %v827_v39 = vadd.f32 %v5013_v38, %v6709_v45  ;;  %v818_v40 = vpop.f32.mrb[15].mxu1  ;;  %5095 = vmatmul.mubr.bf16.gmra.mrb[8].mxu0 %v6739_v30  ;;  %5191 = vmatmul.mubr.bf16.gmra.mrb[48].mxu1 %v6739_v30  ;;  %v908_v42 = vmax.f32 %v824_v33, 0.0 }
 0x1df   : > { %v819_v41 = vadd.f32 %v6709_v45, %v818_v40  ;;  %5127 = vmatpush3.bf16.msra.mxu0 %v5898_v26  ;;  %5223 = vmatpush3.bf16.msra.mxu1 %v5905_v27  ;;  %v906_v47 = vmax.f32 %v816_v37, 0.0 }
 0x1e0   : > { %v909_v43 = vmax.f32 %v827_v39, 0.0  ;;  %5128 = vmatprep.subr.bf16.mxu0 %v5901_v35  ;;  %5224 = vmatprep.subr.bf16.mxu1 %v5906_v36 }
 0x1e1   : > { %v907_v48 = vmax.f32 %v819_v41, 0.0 }
 0x1e2   : > { %v6751_v49 = vpack.c.bf16 %v909_v43, %v908_v42 }
 0x1e3   : > { %v6753_v50 = vpack.c.bf16 %v907_v48, %v906_v47  ;;  %v5016_v51 = vpop.f32.mrb[16].mxu1  ;;  %5129 = vmatpush3.bf16.msra.mxu0 %v5901_v35  ;;  %5225 = vmatpush3.bf16.msra.mxu1 %v5906_v36 }
 0x1e4   : > { %v840_v52 = vadd.f32 %v5016_v51, %v6709_v45  ;;  %v831_v53 = vpop.f32.mrb[17].mxu1  ;;  %5130 = vmatprep.subr.bf16.mxu0 %v5904_v44  ;;  %5226 = vmatprep.subr.bf16.mxu1 %v5908_v46 }
 0x1e5   : > { %v832_v56 = vadd.f32 %v6709_v45, %v831_v53  ;;  %v5017_v57 = vpop.f32.mrb[18].mxu1  ;;  %5098 = vmatprep.mubr.bf16.mxu0 %v6753_v50  ;;  %5194 = vmatprep.mubr.bf16.mxu1 %v6753_v50 }
 0x1e6   : > { %v843_v60 = vadd.f32 %v5017_v57, %v6709_v45  ;;  %v834_v61 = vpop.f32.mrb[19].mxu1  ;;  %5099 = vmatmul.mubr.bf16.gmra.mrb[12].mxu0 %v6751_v49  ;;  %5195 = vmatmul.mubr.bf16.gmra.mrb[52].mxu1 %v6751_v49  ;;  %v912_v63 = vmax.f32 %v840_v52, 0.0 }
 0x1e7   : > { %v835_v62 = vadd.f32 %v6709_v45, %v834_v61  ;;  %5131 = vmatpush3.bf16.msra.mxu0 %v5904_v44  ;;  %5227 = vmatpush3.bf16.msra.mxu1 %v5908_v46  ;;  %v910_v3 = vmax.f32 %v832_v56, 0.0  ;;  %v6238_v61 = vmov 0  }
 0x1e8   : > { %v913_v0 = vmax.f32 %v843_v60, 0.0  ;;  %5132 = vmatprep.subr.bf16.mxu0 %v5907_v54  ;;  %5228 = vmatprep.subr.bf16.mxu1 %v5909_v55 }
 0x1e9   : > { %v911_v4 = vmax.f32 %v835_v62, 0.0  ;;  %v5911_v62 = vld [vmem:[#allocation11 + $0x148] sm:$0xff]  }
 0x1ea   : > { %v6767_v5 = vpack.c.bf16 %v913_v0, %v912_v63  ;;  %v5916_v63 = vld [vmem:[#allocation11 + $0x1c8] sm:$0xff]   ;;  %v5912_v0 = vld [vmem:[#allocation11 + $0x150] sm:$0xff]  }
 0x1eb   : > { %v6769_v6 = vpack.c.bf16 %v911_v4, %v910_v3  ;;  %v5020_v7 = vpop.f32.mrb[20].mxu1  ;;  %5133 = vmatpush3.bf16.msra.mxu0 %v5907_v54  ;;  %5229 = vmatpush3.bf16.msra.mxu1 %v5909_v55  ;;  %v5918_v3 = vld [vmem:[#allocation11 + $0x1d0] sm:$0xff]   ;;  %v5913_v4 = vld [vmem:[#allocation11 + $0x158] sm:$0xff]  }
 0x1ec   : > { %v856_v8 = vadd.f32 %v5020_v7, %v6709_v45  ;;  %v847_v9 = vpop.f32.mrb[21].mxu1  ;;  %5262 = vmatprep.subr.bf16.mxu0 %v6763_v1  ;;  %5406 = vmatprep.subr.bf16.mxu1 %v6765_v2  ;;  %v5919_v7 = vld [vmem:[#allocation11 + $0x1d8] sm:$0xff]  }
 0x1ed   : > { %v848_v10 = vadd.f32 %v6709_v45, %v847_v9  ;;  %v5021_v11 = vpop.f32.mrb[22].mxu1  ;;  %5102 = vmatprep.mubr.bf16.mxu0 %v6769_v6  ;;  %5198 = vmatprep.mubr.bf16.mxu1 %v6769_v6  ;;  %v5922_v9 = vld [vmem:[#allocation11 + $0x1e8] sm:$0xff]  }
 0x1ee   : > { %v859_v14 = vadd.f32 %v5021_v11, %v6709_v45  ;;  %v850_v15 = vpop.f32.mrb[23].mxu1  ;;  %5103 = vmatmul.mubr.bf16.gmra.mrb[16].mxu0 %v6767_v5  ;;  %5199 = vmatmul.mubr.bf16.gmra.mrb[56].mxu1 %v6767_v5  ;;  %v916_v17 = vmax.f32 %v856_v8, 0.0  ;;  %v5917_v8 = vld [vmem:[#allocation11 + $0x168] sm:$0xff]  }
 0x1ef   : > { %v851_v16 = vadd.f32 %v6709_v45, %v850_v15  ;;  %v914_v19 = vmax.f32 %v848_v10, 0.0  ;;  %v5920_v10 = vld [vmem:[#allocation11 + $0x170] sm:$0xff]  }
 0x1f0   : > { %v917_v18 = vmax.f32 %v859_v14, 0.0  ;;  %v5924_v14 = vld [vmem:[#allocation11 + $0x1f0] sm:$0xff]  }
 0x1f1   : > { %v915_v20 = vmax.f32 %v851_v16, 0.0  ;;  %v5923_v16 = vld [vmem:[#allocation11 + $0x178] sm:$0xff]  }
 0x1f2   : > { %v6781_v21 = vpack.c.bf16 %v917_v18, %v916_v17  ;;  %v5925_v18 = vld [vmem:[#allocation11 + $0x1f8] sm:$0xff]  }
 0x1f3   : > { %v6783_v22 = vpack.c.bf16 %v915_v20, %v914_v19  ;;  %v5024_v23 = vpop.f32.mrb[24].mxu1  ;;  %v5926_v20 = vld [vmem:[#allocation11 + $0x80] sm:$0xff]  }
 0x1f4   : > { %v872_v24 = vadd.f32 %v5024_v23, %v6709_v45  ;;  %v863_v25 = vpop.f32.mrb[25].mxu1  ;;  %v5927_v23 = vld [vmem:[#allocation11 + $0x88] sm:$0xff]  }
 0x1f5   : > { %v864_v26 = vadd.f32 %v6709_v45, %v863_v25  ;;  %v5025_v27 = vpop.f32.mrb[26].mxu1  ;;  %5106 = vmatprep.mubr.bf16.mxu0 %v6783_v22  ;;  %5202 = vmatprep.mubr.bf16.mxu1 %v6783_v22  ;;  %v5929_v25 = vld [vmem:[#allocation11 + $0x98] sm:$0xff]  }
 0x1f6   : > { %v875_v28 = vadd.f32 %v5025_v27, %v6709_v45  ;;  %v866_v29 = vpop.f32.mrb[27].mxu1  ;;  %5107 = vmatmul.mubr.bf16.gmra.mrb[20].mxu0 %v6781_v21  ;;  %5203 = vmatmul.mubr.bf16.gmra.mrb[60].mxu1 %v6781_v21  ;;  %v920_v33 = vmax.f32 %v872_v24, 0.0  ;;  %v5928_v24 = vld [vmem:[#allocation11 + $0x90] sm:$0xff]   ;;  %v5931_v27 = vld [vmem:[#allocation11 + $0xa8] sm:$0xff]  }
 0x1f7   : > { %v867_v32 = vadd.f32 %v6709_v45, %v866_v29  ;;  %v918_v35 = vmax.f32 %v864_v26, 0.0  ;;  %v5930_v26 = vld [vmem:[#allocation11 + $0xa0] sm:$0xff]   ;;  %v5933_v29 = vld [vmem:[#allocation11 + $0xb8] sm:$0xff]  }
 0x1f8   : > { %v921_v34 = vmax.f32 %v875_v28, 0.0  ;;  %v5932_v28 = vld [vmem:[#allocation11 + $0xb0] sm:$0xff]  }
 0x1f9   : > { %v919_v36 = vmax.f32 %v867_v32, 0.0  ;;  %v5934_v32 = vld [vmem:[#allocation11 + $0x180] sm:$0xff]  }
 0x1fa   : > { %v6793_v37 = vpack.c.bf16 %v921_v34, %v920_v33  ;;  %v5935_v33 = vld [vmem:[#allocation11 + $0x188] sm:$0xff]   ;;  %v5936_v34 = vld [vmem:[#allocation11 + $0x190] sm:$0xff]  }
 0x1fb   : > { %v6795_v38 = vpack.c.bf16 %v919_v36, %v918_v35  ;;  %v5028_v39 = vpop.f32.mrb[28].mxu1  ;;  %v5937_v35 = vld [vmem:[#allocation11 + $0x198] sm:$0xff]   ;;  %v5938_v36 = vld [vmem:[#allocation11 + $0x1a0] sm:$0xff]  }
 0x1fc   : > { %v888_v40 = vadd.f32 %v5028_v39, %v6709_v45  ;;  %v879_v41 = vpop.f32.mrb[29].mxu1  ;;  %v5939_v39 = vld [vmem:[#allocation11 + $0x1a8] sm:$0xff]  }
 0x1fd   : > { %v880_v42 = vadd.f32 %v6709_v45, %v879_v41  ;;  %v5029_v43 = vpop.f32.mrb[30].mxu1  ;;  %5110 = vmatprep.mubr.bf16.mxu0 %v6795_v38  ;;  %5206 = vmatprep.mubr.bf16.mxu1 %v6795_v38  ;;  %v5942_v41 = vld [vmem:[#allocation11 + $0x200] sm:$0xff]  }
 0x1fe   : > { %v891_v44 = vadd.f32 %v5029_v43, %v6709_v45  ;;  %v882_v46 = vpop.f32.mrb[31].mxu1  ;;  %5111 = vmatmul.mubr.bf16.gmra.mrb[24].mxu0 %v6793_v37  ;;  %5207 = vmatmul.mubr.bf16.gmra.mrb[64].mxu1 %v6793_v37  ;;  %v924_v48 = vmax.f32 %v888_v40, 0.0  ;;  %v5941_v40 = vld [vmem:[#allocation11 + $0x1b8] sm:$0xff]   ;;  %v5944_v43 = vld [vmem:[#allocation11 + $0x210] sm:$0xff]  }
 0x1ff   : > { %v883_v47 = vadd.f32 %v6709_v45, %v882_v46  ;;  %v922_v52 = vmax.f32 %v880_v42, 0.0  ;;  %v5943_v42 = vld [vmem:[#allocation11 + $0x208] sm:$0xff]   ;;  %v5946_v46 = vld [vmem:[#allocation11 + $0x220] sm:$0xff]  }
 0x200   : > { %v925_v51 = vmax.f32 %v891_v44, 0.0  ;;  %v5945_v44 = vld [vmem:[#allocation11 + $0x218] sm:$0xff]  }
 0x201   : > { %v923_v53 = vmax.f32 %v883_v47, 0.0  ;;  %v5947_v47 = vld [vmem:[#allocation11 + $0x228] sm:$0xff]  }
 0x202   : > { %v6805_v54 = vpack.c.bf16 %v925_v51, %v924_v48  ;;  %v5948_v48 = vld [vmem:[#allocation11 + $0x230] sm:$0xff]   ;;  %v5949_v51 = vld [vmem:[#allocation11 + $0x238] sm:$0xff]  }
 0x203   : > { %v6807_v55 = vpack.c.bf16 %v923_v53, %v922_v52  ;;  %v1001_v56 = vpop.f32.mrb[32].mxu1 }
 0x204   : > { %v5048_v57 = vpop.f32.mrb[33].mxu1 }
 0x205   : > { %5114 = vmatprep.mubr.bf16.mxu0 %v6807_v55  ;;  %5210 = vmatprep.mubr.bf16.mxu1 %v6807_v55  ;;  %v1004_v60 = vpop.f32.mrb[34].mxu1 }
 0x206   : > { %5115 = vmatmul.mubr.bf16.gmra.mrb[28].mxu0 %v6805_v54  ;;  %5211 = vmatmul.mubr.bf16.gmra.mrb[68].mxu1 %v6805_v54  ;;  %v5049_v45 = vpop.f32.mrb[35].mxu1  ;;  %v5950_v60 = vld [vmem:[#allocation12] sm:$0xff]  }
 0x207   : > { %5134 = vmatprep.mubr.bf16.mxu0 %v6238_v61  ;;  %5230 = vmatprep.mubr.bf16.mxu1 %v6238_v61 }
 0x20e   : > { %5135 = vmatmul.mubr.bf16.vlgmr.msra.gmra.mrb[0].mxu0 %v6717_v59  ;;  %5231 = vmatmul.mubr.bf16.vlgmr.msra.gmra.mrb[40].mxu1 %v6717_v59 }
 0x20f   : > { %5263 = vmatpush3.bf16.msra.mxu0 %v6763_v1  ;;  %5138 = vmatprep.mubr.bf16.mxu0 %v6715_v58  ;;  %v5914_v1 = vld [vmem:[#allocation11 + $0x160] sm:$0xff]  }
 0x210   : > { %5234 = vmatprep.mubr.bf16.mxu1 %v6715_v58  ;;  %5264 = vmatprep.subr.bf16.mxu0 %v5911_v62 }
 0x211   : > { %5407 = vmatpush3.bf16.msra.mxu1 %v6765_v2  ;;  %v5921_v2 = vld [vmem:[#allocation11 + $0x1e0] sm:$0xff]  }
 0x212   : > { %5408 = vmatprep.subr.bf16.mxu1 %v5916_v63 }
 0x213   : > { %5265 = vmatpush3.bf16.msra.mxu0 %v5911_v62 }
 0x214   : > { %5266 = vmatprep.subr.bf16.mxu0 %v5912_v0 }
 0x215   : > { %5409 = vmatpush3.bf16.msra.mxu1 %v5916_v63 }
 0x216   : > { %5139 = vmatmul.mubr.bf16.gmra.mrb[4].mxu0 %v6729_v13  ;;  %5235 = vmatmul.mubr.bf16.gmra.mrb[44].mxu1 %v6729_v13 }
 0x217   : > { %5142 = vmatprep.mubr.bf16.mxu0 %v6727_v12  ;;  %5238 = vmatprep.mubr.bf16.mxu1 %v6727_v12 }
 0x218   : > { %5267 = vmatpush3.bf16.msra.mxu0 %v5912_v0  ;;  %5410 = vmatprep.subr.bf16.mxu1 %v5918_v3 }
 0x219   : > { %5268 = vmatprep.subr.bf16.mxu0 %v5913_v4  ;;  %5411 = vmatpush3.bf16.msra.mxu1 %v5918_v3 }
 0x21a   : > { %5412 = vmatprep.subr.bf16.mxu1 %v5919_v7 }
 0x21c   : > { %5269 = vmatpush3.bf16.msra.mxu0 %v5913_v4  ;;  %v5952_v4 = vld [vmem:[#allocation12 + $0x10] sm:$0xff]  }
 0x21d   : > { %5270 = vmatprep.subr.bf16.mxu0 %v5914_v1  ;;  %5413 = vmatpush3.bf16.msra.mxu1 %v5919_v7 }
 0x21e   : > { %5143 = vmatmul.mubr.bf16.gmra.mrb[8].mxu0 %v6741_v31  ;;  %5239 = vmatmul.mubr.bf16.gmra.mrb[48].mxu1 %v6741_v31 }
 0x21f   : > { %5146 = vmatprep.mubr.bf16.mxu0 %v6739_v30  ;;  %5242 = vmatprep.mubr.bf16.mxu1 %v6739_v30 }
 0x220   : > { %5271 = vmatpush3.bf16.msra.mxu0 %v5914_v1  ;;  %5414 = vmatprep.subr.bf16.mxu1 %v5921_v2 }
 0x221   : > { %5272 = vmatprep.subr.bf16.mxu0 %v5917_v8  ;;  %5415 = vmatpush3.bf16.msra.mxu1 %v5921_v2  ;;  %v5953_v2 = vld [vmem:[#allocation12 + $0x18] sm:$0xff]  }
 0x222   : > { %5416 = vmatprep.subr.bf16.mxu1 %v5922_v9 }
 0x223   : > { %v1054_v11 = vpop.f32.mrb[36].mxu1 }
 0x224   : > { %5273 = vmatpush3.bf16.msra.mxu0 %v5917_v8  ;;  %v5068_v15 = vpop.f32.mrb[37].mxu1  ;;  %v5954_v11 = vld [vmem:[#allocation12 + $0x20] sm:$0xff]  }
 0x225   : > { %5274 = vmatprep.subr.bf16.mxu0 %v5920_v10  ;;  %5417 = vmatpush3.bf16.msra.mxu1 %v5922_v9  ;;  %v1057_v17 = vpop.f32.mrb[38].mxu1 }
 0x226   : > { %5147 = vmatmul.mubr.bf16.gmra.mrb[12].mxu0 %v6753_v50  ;;  %5243 = vmatmul.mubr.bf16.gmra.mrb[52].mxu1 %v6753_v50  ;;  %v5069_v19 = vpop.f32.mrb[39].mxu1  ;;  %v5955_v17 = vld [vmem:[#allocation12 + $0x28] sm:$0xff]  }
 0x227   : > { %5150 = vmatprep.mubr.bf16.mxu0 %v6751_v49  ;;  %5246 = vmatprep.mubr.bf16.mxu1 %v6751_v49  ;;  %v5957_v19 = vld [vmem:[#allocation12 + $0x38] sm:$0xff]  }
 0x228   : > { %5275 = vmatpush3.bf16.msra.mxu0 %v5920_v10  ;;  %5418 = vmatprep.subr.bf16.mxu1 %v5924_v14 }
 0x229   : > { %5276 = vmatprep.subr.bf16.mxu0 %v5923_v16  ;;  %5419 = vmatpush3.bf16.msra.mxu1 %v5924_v14 }
 0x22a   : > { %5420 = vmatprep.subr.bf16.mxu1 %v5925_v18 }
 0x22c   : > { %5277 = vmatpush3.bf16.msra.mxu0 %v5923_v16 }
 0x22d   : > { %5421 = vmatpush3.bf16.msra.mxu1 %v5925_v18  ;;  %5310 = vmatprep.subr.bf16.mxu0 %v5926_v20  ;;  %v5956_v18 = vld [vmem:[#allocation12 + $0x30] sm:$0xff]  }
 0x22e   : > { %5151 = vmatmul.mubr.bf16.gmra.mrb[16].mxu0 %v6769_v6  ;;  %5247 = vmatmul.mubr.bf16.gmra.mrb[56].mxu1 %v6769_v6 }
 0x22f   : > { %5154 = vmatprep.mubr.bf16.mxu0 %v6767_v5  ;;  %5250 = vmatprep.mubr.bf16.mxu1 %v6767_v5 }
 0x230   : > { %5502 = vmatprep.subr.bf16.mxu1 %v5950_v60 }
 0x236   : > { %5155 = vmatmul.mubr.bf16.gmra.mrb[20].mxu0 %v6783_v22  ;;  %5251 = vmatmul.mubr.bf16.gmra.mrb[60].mxu1 %v6783_v22 }
 0x237   : > { %5158 = vmatprep.mubr.bf16.mxu0 %v6781_v21  ;;  %5254 = vmatprep.mubr.bf16.mxu1 %v6781_v21 }
 0x23e   : > { %5159 = vmatmul.mubr.bf16.gmra.mrb[24].mxu0 %v6795_v38  ;;  %5255 = vmatmul.mubr.bf16.gmra.mrb[64].mxu1 %v6795_v38 }
 0x23f   : > { %5162 = vmatprep.mubr.bf16.mxu0 %v6793_v37  ;;  %5258 = vmatprep.mubr.bf16.mxu1 %v6793_v37 }
 0x246   : > { %5163 = vmatmul.mubr.bf16.gmra.mrb[28].mxu0 %v6807_v55  ;;  %5259 = vmatmul.mubr.bf16.gmra.mrb[68].mxu1 %v6807_v55 }
 0x247   : > { %5278 = vmatprep.mubr.bf16.mxu0 %v6717_v59  ;;  %5422 = vmatprep.mubr.bf16.mxu1 %v6715_v58 }
 0x24e   : > { %5279 = vmatmul.mubr.bf16.vlgmr.msra.gmra.mrb[32].mxu0 %v6715_v58  ;;  %5423 = vmatmul.mubr.bf16.vlgmr.msra.gmra.mrb[40].mxu1 %v6729_v13 }
 0x24f   : > { %5311 = vmatpush3.bf16.msra.mxu0 %v5926_v20  ;;  %5282 = vmatprep.mubr.bf16.mxu0 %v6729_v13  ;;  %v3256_v20 = vlaneseq }
 0x250   : > { %5426 = vmatprep.mubr.bf16.mxu1 %v6727_v12  ;;  %5312 = vmatprep.subr.bf16.mxu0 %v5927_v23 }
 0x251   : > { %5503 = vmatpush3.bf16.msra.mxu1 %v5950_v60 }
 0x253   : > { %5313 = vmatpush3.bf16.msra.mxu0 %v5927_v23  ;;  %v6991_v23 = vshrl.u32 %v3256_v20, 7 }
 0x254   : > { %5314 = vmatprep.subr.bf16.mxu0 %v5928_v24 }
 0x255   : > { %vm3293_vm1 = vcmp.lt.s32.totalorder %v6991_v23, 1  ;;  %vm3259_vm2 = vcmp.ge.s32.totalorder %v6991_v23, 1  ;;  %vm3428_vm3 = vcmp.lt.s32.totalorder %v6991_v23, 7 }
 0x256   : > { %5283 = vmatmul.mubr.bf16.gmra.mrb[36].mxu0 %v6727_v12  ;;  %5427 = vmatmul.mubr.bf16.gmra.mrb[44].mxu1 %v6741_v31 }
 0x257   : > { %5286 = vmatprep.mubr.bf16.mxu0 %v6741_v31  ;;  %5430 = vmatprep.mubr.bf16.mxu1 %v6739_v30 }
 0x258   : > { %5315 = vmatpush3.bf16.msra.mxu0 %v5928_v24 }
 0x259   : > { %5316 = vmatprep.subr.bf16.mxu0 %v5929_v25 }
 0x25c   : > { %5317 = vmatpush3.bf16.msra.mxu0 %v5929_v25 }
 0x25d   : > { %5318 = vmatprep.subr.bf16.mxu0 %v5930_v26 }
 0x25e   : > { %5287 = vmatmul.mubr.bf16.gmra.mrb[40].mxu0 %v6739_v30  ;;  %5431 = vmatmul.mubr.bf16.gmra.mrb[48].mxu1 %v6753_v50 }
 0x25f   : > { %5290 = vmatprep.mubr.bf16.mxu0 %v6753_v50  ;;  %5434 = vmatprep.mubr.bf16.mxu1 %v6751_v49 }
 0x260   : > { %5319 = vmatpush3.bf16.msra.mxu0 %v5930_v26 }
 0x261   : > { %5320 = vmatprep.subr.bf16.mxu0 %v5931_v27 }
 0x264   : > { %5321 = vmatpush3.bf16.msra.mxu0 %v5931_v27 }
 0x265   : > { %5322 = vmatprep.subr.bf16.mxu0 %v5932_v28 }
 0x266   : > { %5291 = vmatmul.mubr.bf16.gmra.mrb[44].mxu0 %v6751_v49  ;;  %5435 = vmatmul.mubr.bf16.gmra.mrb[52].mxu1 %v6769_v6 }
 0x267   : > { %5294 = vmatprep.mubr.bf16.mxu0 %v6769_v6  ;;  %5438 = vmatprep.mubr.bf16.mxu1 %v6767_v5 }
 0x268   : > { %5323 = vmatpush3.bf16.msra.mxu0 %v5932_v28 }
 0x269   : > { %5324 = vmatprep.subr.bf16.mxu0 %v5933_v29 }
 0x26c   : > { %5325 = vmatpush3.bf16.msra.mxu0 %v5933_v29 }
 0x26d   : > { %5358 = vmatprep.subr.bf16.mxu0 %v5934_v32 }
 0x26e   : > { %5295 = vmatmul.mubr.bf16.gmra.mrb[48].mxu0 %v6767_v5  ;;  %5439 = vmatmul.mubr.bf16.gmra.mrb[56].mxu1 %v6783_v22 }
 0x26f   : > { %5298 = vmatprep.mubr.bf16.mxu0 %v6783_v22  ;;  %5442 = vmatprep.mubr.bf16.mxu1 %v6781_v21 }
 0x276   : > { %5299 = vmatmul.mubr.bf16.gmra.mrb[52].mxu0 %v6781_v21  ;;  %5443 = vmatmul.mubr.bf16.gmra.mrb[60].mxu1 %v6795_v38 }
 0x277   : > { %5302 = vmatprep.mubr.bf16.mxu0 %v6795_v38  ;;  %5446 = vmatprep.mubr.bf16.mxu1 %v6793_v37 }
 0x27e   : > { %5303 = vmatmul.mubr.bf16.gmra.mrb[56].mxu0 %v6793_v37  ;;  %5447 = vmatmul.mubr.bf16.gmra.mrb[64].mxu1 %v6807_v55 }
 0x27f   : > { %5306 = vmatprep.mubr.bf16.mxu0 %v6807_v55  ;;  %5450 = vmatprep.mubr.bf16.mxu1 %v6805_v54 }
 0x286   : > { %5307 = vmatmul.mubr.bf16.gmra.mrb[60].mxu0 %v6805_v54  ;;  %5451 = vmatmul.mubr.bf16.gmra.mrb[68].mxu1 %v6238_v61 }
 0x287   : > { %5326 = vmatprep.mubr.bf16.mxu0 %v6238_v61 }
 0x28e   : > { %5327 = vmatmul.mubr.bf16.vlgmr.msra.gmra.mrb[32].mxu0 %v6717_v59  ;;  %v5940_v59 = vld [vmem:[#allocation11 + $0x1b0] sm:$0xff]  }
 0x28f   : > { %5359 = vmatpush3.bf16.msra.mxu0 %v5934_v32  ;;  %5330 = vmatprep.mubr.bf16.mxu0 %v6715_v58 }
 0x290   : > { %5360 = vmatprep.subr.bf16.mxu0 %v5935_v33 }
 0x293   : > { %5361 = vmatpush3.bf16.msra.mxu0 %v5935_v33 }
 0x294   : > { %5362 = vmatprep.subr.bf16.mxu0 %v5936_v34 }
 0x296   : > { %5331 = vmatmul.mubr.bf16.gmra.mrb[36].mxu0 %v6729_v13 }
 0x297   : > { %5334 = vmatprep.mubr.bf16.mxu0 %v6727_v12  ;;  %5363 = vmatpush3.bf16.msra.mxu0 %v5936_v34 }
 0x298   : > { %5364 = vmatprep.subr.bf16.mxu0 %v5937_v35 }
 0x29b   : > { %5365 = vmatpush3.bf16.msra.mxu0 %v5937_v35 }
 0x29c   : > { %5366 = vmatprep.subr.bf16.mxu0 %v5938_v36 }
 0x29e   : > { %5335 = vmatmul.mubr.bf16.gmra.mrb[40].mxu0 %v6741_v31 }
 0x29f   : > { %5338 = vmatprep.mubr.bf16.mxu0 %v6739_v30  ;;  %5367 = vmatpush3.bf16.msra.mxu0 %v5938_v36 }
 0x2a0   : > { %5368 = vmatprep.subr.bf16.mxu0 %v5939_v39 }
 0x2a3   : > { %5369 = vmatpush3.bf16.msra.mxu0 %v5939_v39 }
 0x2a4   : > { %5370 = vmatprep.subr.bf16.mxu0 %v5940_v59 }
 0x2a6   : > { %5339 = vmatmul.mubr.bf16.gmra.mrb[44].mxu0 %v6753_v50 }
 0x2a7   : > { %5342 = vmatprep.mubr.bf16.mxu0 %v6751_v49  ;;  %5371 = vmatpush3.bf16.msra.mxu0 %v5940_v59 }
 0x2a8   : > { %5372 = vmatprep.subr.bf16.mxu0 %v5941_v40 }
 0x2ab   : > { %5373 = vmatpush3.bf16.msra.mxu0 %v5941_v40 }
 0x2ac   : > { %5454 = vmatprep.subr.bf16.mxu0 %v5942_v41 }
 0x2ae   : > { %5343 = vmatmul.mubr.bf16.gmra.mrb[48].mxu0 %v6769_v6 }
 0x2af   : > { %5346 = vmatprep.mubr.bf16.mxu0 %v6767_v5 }
 0x2b6   : > { %5347 = vmatmul.mubr.bf16.gmra.mrb[52].mxu0 %v6783_v22 }
 0x2b7   : > { %5350 = vmatprep.mubr.bf16.mxu0 %v6781_v21 }
 0x2be   : > { %5351 = vmatmul.mubr.bf16.gmra.mrb[56].mxu0 %v6795_v38 }
 0x2bf   : > { %5354 = vmatprep.mubr.bf16.mxu0 %v6793_v37 }
 0x2c6   : > { %5355 = vmatmul.mubr.bf16.gmra.mrb[60].mxu0 %v6807_v55 }
 0x2c7   : > { %5374 = vmatprep.mubr.bf16.mxu0 %v6715_v58 }
 0x2ce   : > { %5375 = vmatmul.mubr.bf16.vlgmr.msra.gmra.mrb[0].mxu0 %v6729_v13 }
 0x2cf   : > { %5455 = vmatpush3.bf16.msra.mxu0 %v5942_v41  ;;  %5378 = vmatprep.mubr.bf16.mxu0 %v6727_v12 }
 0x2d0   : > { %5456 = vmatprep.subr.bf16.mxu0 %v5943_v42 }
 0x2d3   : > { %5457 = vmatpush3.bf16.msra.mxu0 %v5943_v42 }
 0x2d4   : > { %5458 = vmatprep.subr.bf16.mxu0 %v5944_v43 }
 0x2d6   : > { %5379 = vmatmul.mubr.bf16.gmra.mrb[4].mxu0 %v6741_v31 }
 0x2d7   : > { %5382 = vmatprep.mubr.bf16.mxu0 %v6739_v30  ;;  %5459 = vmatpush3.bf16.msra.mxu0 %v5944_v43 }
 0x2d8   : > { %5460 = vmatprep.subr.bf16.mxu0 %v5945_v44 }
 0x2db   : > { %5461 = vmatpush3.bf16.msra.mxu0 %v5945_v44 }
 0x2dc   : > { %5462 = vmatprep.subr.bf16.mxu0 %v5946_v46 }
 0x2de   : > { %5383 = vmatmul.mubr.bf16.gmra.mrb[8].mxu0 %v6753_v50 }
 0x2df   : > { %5386 = vmatprep.mubr.bf16.mxu0 %v6751_v49  ;;  %5463 = vmatpush3.bf16.msra.mxu0 %v5946_v46 }
 0x2e0   : > { %5464 = vmatprep.subr.bf16.mxu0 %v5947_v47 }
 0x2e3   : > { %5465 = vmatpush3.bf16.msra.mxu0 %v5947_v47 }
 0x2e4   : > { %5466 = vmatprep.subr.bf16.mxu0 %v5948_v48 }
 0x2e6   : > { %5387 = vmatmul.mubr.bf16.gmra.mrb[12].mxu0 %v6769_v6 }
 0x2e7   : > { %5390 = vmatprep.mubr.bf16.mxu0 %v6767_v5  ;;  %5467 = vmatpush3.bf16.msra.mxu0 %v5948_v48 }
 0x2e8   : > { %5468 = vmatprep.subr.bf16.mxu0 %v5949_v51 }
 0x2eb   : > { %5469 = vmatpush3.bf16.msra.mxu0 %v5949_v51 }
 0x2ee   : > { %5391 = vmatmul.mubr.bf16.gmra.mrb[16].mxu0 %v6783_v22 }
 0x2ef   : > { %5394 = vmatprep.mubr.bf16.mxu0 %v6781_v21 }
 0x2f6   : > { %5395 = vmatmul.mubr.bf16.gmra.mrb[20].mxu0 %v6795_v38 }
 0x2f7   : > { %5398 = vmatprep.mubr.bf16.mxu0 %v6793_v37 }
 0x2fe   : > { %5399 = vmatmul.mubr.bf16.gmra.mrb[24].mxu0 %v6807_v55 }
 0x2ff   : > { %5402 = vmatprep.mubr.bf16.mxu0 %v6805_v54 }
 0x306   : > { %5403 = vmatmul.mubr.bf16.gmra.mrb[28].mxu0 %v6238_v61 }
 0x307   : > { %5470 = vmatprep.mubr.bf16.mxu0 %v6715_v58 }
 0x30e   : > { %5471 = vmatmul.mubr.bf16.vlgmr.msra.gmra.mrb[32].mxu0 %v6729_v13 }
 0x30f   : > { %5474 = vmatprep.mubr.bf16.mxu0 %v6727_v12 }
 0x316   : > { %5475 = vmatmul.mubr.bf16.gmra.mrb[36].mxu0 %v6741_v31 }
 0x317   : > { %5478 = vmatprep.mubr.bf16.mxu0 %v6739_v30 }
 0x31e   : > { %5479 = vmatmul.mubr.bf16.gmra.mrb[40].mxu0 %v6753_v50 }
 0x31f   : > { %5482 = vmatprep.mubr.bf16.mxu0 %v6751_v49 }
 0x321   : > { %v6918_v52 = vpop.f32.mrb[40].mxu1 }
 0x322   : > { %v6920_v53 = vpop.f32.mrb[41].mxu1 }
 0x323   : > { %v6922_v56 = vpop.f32.mrb[42].mxu1 }
 0x324   : > { %v6924_v57 = vpop.f32.mrb[43].mxu1 }
 0x326   : > { %5483 = vmatmul.mubr.bf16.gmra.mrb[44].mxu0 %v6769_v6 }
 0x327   : > { %5486 = vmatprep.mubr.bf16.mxu0 %v6767_v5 }
 0x329   : > { %v6928_v58 = vpop.f32.mrb[44].mxu1 }
 0x32a   : > { %v6930_v12 = vpop.f32.mrb[45].mxu1 }
 0x32b   : > { %v6932_v13 = vpop.f32.mrb[46].mxu1 }
 0x32c   : > { %v6934_v30 = vpop.f32.mrb[47].mxu1 }
 0x32e   : > { %5487 = vmatmul.mubr.bf16.gmra.mrb[48].mxu0 %v6783_v22 }
 0x32f   : > { %5490 = vmatprep.mubr.bf16.mxu0 %v6781_v21 }
 0x331   : > { %v6938_v31 = vpop.f32.mrb[48].mxu1 }
 0x332   : > { %v6940_v49 = vpop.f32.mrb[49].mxu1 }
 0x333   : > { %v6942_v50 = vpop.f32.mrb[50].mxu1 }
 0x334   : > { %v6944_v6 = vpop.f32.mrb[51].mxu1 }
 0x336   : > { %5491 = vmatmul.mubr.bf16.gmra.mrb[52].mxu0 %v6795_v38  ;;  %v5951_v38 = vld [vmem:[#allocation12 + $0x8] sm:$0xff]  }
 0x337   : > { %5494 = vmatprep.mubr.bf16.mxu0 %v6793_v37  ;;  %5504 = vmatprep.subr.bf16.mxu1 %v5951_v38 }
 0x338   : > { %5505 = vmatpush3.bf16.msra.mxu1 %v5951_v38 }
 0x339   : > { %v6948_v5 = vpop.f32.mrb[52].mxu1  ;;  %5506 = vmatprep.subr.bf16.mxu1 %v5952_v4 }
 0x33a   : > { %v6950_v45 = vpop.f32.mrb[53].mxu1 }
 0x33b   : > { %v6952_v22 = vpop.f32.mrb[54].mxu1 }
 0x33c   : > { %v6954_v21 = vpop.f32.mrb[55].mxu1  ;;  %5507 = vmatpush3.bf16.msra.mxu1 %v5952_v4 }
 0x33d   : > { %5508 = vmatprep.subr.bf16.mxu1 %v5953_v2 }
 0x33e   : > { %5495 = vmatmul.mubr.bf16.gmra.mrb[56].mxu0 %v6807_v55 }
 0x33f   : > { %5498 = vmatprep.mubr.bf16.mxu0 %v6805_v54 }
 0x340   : > { %5509 = vmatpush3.bf16.msra.mxu1 %v5953_v2 }
 0x341   : > { %v6958_v62 = vpop.f32.mrb[56].mxu1  ;;  %5510 = vmatprep.subr.bf16.mxu1 %v5954_v11 }
 0x342   : > { %v6960_v63 = vpop.f32.mrb[57].mxu1 }
 0x343   : > { %v6962_v37 = vpop.f32.mrb[58].mxu1 }
 0x344   : > { %v6964_v0 = vpop.f32.mrb[59].mxu1  ;;  %5511 = vmatpush3.bf16.msra.mxu1 %v5954_v11 }
 0x345   : > { %5512 = vmatprep.subr.bf16.mxu1 %v5955_v17 }
 0x346   : > { %5499 = vmatmul.mubr.bf16.gmra.mrb[60].mxu0 %v6238_v61 }
 0x348   : > { %5513 = vmatpush3.bf16.msra.mxu1 %v5955_v17 }
 0x349   : > { %v6967_v3 = vpop.f32.mrb[60].mxu1  ;;  %5514 = vmatprep.subr.bf16.mxu1 %v5956_v18 }
 0x34a   : > { %v6969_v7 = vpop.f32.mrb[61].mxu1 }
 0x34b   : > { %v6971_v55 = vpop.f32.mrb[62].mxu1 }
 0x34c   : > { %v6973_v54 = vpop.f32.mrb[63].mxu1  ;;  %5515 = vmatpush3.bf16.msra.mxu1 %v5956_v18 }
 0x34d   : > { %5516 = vmatprep.subr.bf16.mxu1 %v5957_v19 }
 0x350   : > { %5517 = vmatpush3.bf16.msra.mxu1 %v5957_v19 }
 0x351   : > { %v6975_v1 = vpop.f32.mrb[64].mxu1 }
 0x352   : > { %v6977_v8 = vpop.f32.mrb[65].mxu1 }
 0x353   : > { %v6979_v9 = vpop.f32.mrb[66].mxu1 }
 0x354   : > { %v6981_v61 = vpop.f32.mrb[67].mxu1 }
 0x359   : > { %v6983_v10 = vpop.f32.mrb[68].mxu1 }
 0x35a   : > { %v6985_v14 = vpop.f32.mrb[69].mxu1 }
 0x35b   : > { %v6987_v15 = vpop.f32.mrb[70].mxu1 }
 0x35c   : > { %v6989_v16 = vpop.f32.mrb[71].mxu1 }
 0x3a1   : > { %v5376_v24 = vpop.f32.mrb[0].mxu0 }
 0x3a2   : > { %v6993_v25 = vpop.f32.mrb[1].mxu0  ;;  %v3263_v27 = vrot.slane %v5376_v24, 7 }
 0x3a3   : > { %v5377_v26 = vpop.f32.mrb[2].mxu0  ;;  %v3261_v32 = vrot.slane %v6993_v25, 7 }
 0x3a4   : > { %v3264_v28 = vrot.slane %v5377_v26, 7  ;;  %v2584_v29 = vpop.f32.mrb[3].mxu0 }
 0x3a5   : > { %v3262_v33 = vrot.slane %v2584_v29, 7 }
 0x3a6   : > { %v3322_v34 = vsel %vm3293_vm1, %v3263_v27, %v3264_v28 }
 0x3a7   : > { %v7001_v35 = vadd.f32 %v6922_v56, %v3322_v34  ;;  %v3323_v36 = vsel %vm3293_vm1, %v3262_v33, %v3263_v27  ;;  %v3324_v39 = vsel %vm3293_vm1, %v3261_v32, %v3262_v33 }
 0x3a8   : > { %v3332_v59 = vsel %vm3259_vm2, %v3323_v36, 0.0  ;;  %v7012_v40 = vadd.f32 %v3324_v39, %v6924_v57 }
 0x3a9   : > { %v7015_v41 = vadd.f32 %v6918_v52, %v3332_v59  ;;  %v5380_v42 = vpop.f32.mrb[4].mxu0 }
 0x3aa   : > { %v2597_v43 = vpop.f32.mrb[5].mxu0  ;;  %v3267_v47 = vrot.slane %v5380_v42, 7 }
 0x3ab   : > { %v3265_v44 = vrot.slane %v2597_v43, 7  ;;  %v5381_v46 = vpop.f32.mrb[6].mxu0 }
 0x3ac   : > { %v3268_v48 = vrot.slane %v5381_v46, 7  ;;  %v2600_v51 = vpop.f32.mrb[7].mxu0 }
 0x3ad   : > { %v3321_v56 = vsel %vm3293_vm1, %v3264_v28, %v3265_v44  ;;  %v3266_v60 = vrot.slane %v2600_v51, 7 }
 0x3ae   : > { %v3334_v38 = vsel %vm3259_vm2, %v3321_v56, 0.0  ;;  %v3318_v57 = vsel %vm3293_vm1, %v3267_v47, %v3268_v48 }
 0x3af   : > { %v7024_v52 = vadd.f32 %v3334_v38, %v6930_v12  ;;  %v7027_v4 = vadd.f32 %v6932_v13, %v3318_v57  ;;  %v3319_v2 = vsel %vm3293_vm1, %v3266_v60, %v3267_v47  ;;  %v3320_v11 = vsel %vm3293_vm1, %v3265_v44, %v3266_v60 }
 0x3b0   : > { %v3336_v17 = vsel %vm3259_vm2, %v3319_v2, 0.0  ;;  %v7036_v18 = vadd.f32 %v3320_v11, %v6934_v30 }
 0x3b1   : > { %v7039_v19 = vadd.f32 %v6928_v58, %v3336_v17  ;;  %v5384_v12 = vpop.f32.mrb[8].mxu0 }
 0x3b2   : > { %v2613_v20 = vpop.f32.mrb[9].mxu0  ;;  %v3271_v26 = vrot.slane %v5384_v12, 7 }
 0x3b3   : > { %v3269_v24 = vrot.slane %v2613_v20, 7  ;;  %v5385_v13 = vpop.f32.mrb[10].mxu0 }
 0x3b4   : > { %v3272_v27 = vrot.slane %v5385_v13, 7  ;;  %v2616_v28 = vpop.f32.mrb[11].mxu0 }
 0x3b5   : > { %v3317_v29 = vsel %vm3293_vm1, %v3268_v48, %v3269_v24  ;;  %v3270_v33 = vrot.slane %v2616_v28, 7 }
 0x3b6   : > { %v3338_v34 = vsel %vm3259_vm2, %v3317_v29, 0.0  ;;  %v3314_v30 = vsel %vm3293_vm1, %v3271_v26, %v3272_v27 }
 0x3b7   : > { %v7048_v58 = vadd.f32 %v3338_v34, %v6940_v49  ;;  %v7051_v36 = vadd.f32 %v6942_v50, %v3314_v30  ;;  %v3315_v39 = vsel %vm3293_vm1, %v3270_v33, %v3271_v26  ;;  %v3316_v59 = vsel %vm3293_vm1, %v3269_v24, %v3270_v33 }
 0x3b8   : > { %v3340_v42 = vsel %vm3259_vm2, %v3315_v39, 0.0  ;;  %v7060_v43 = vadd.f32 %v3316_v59, %v6944_v6 }
 0x3b9   : > { %v7063_v44 = vadd.f32 %v6938_v31, %v3340_v42  ;;  %v5388_v49 = vpop.f32.mrb[12].mxu0 }
 0x3ba   : > { %v2629_v46 = vpop.f32.mrb[13].mxu0  ;;  %v3275_v48 = vrot.slane %v5388_v49, 7 }
 0x3bb   : > { %v3273_v47 = vrot.slane %v2629_v46, 7  ;;  %v5389_v50 = vpop.f32.mrb[14].mxu0 }
 0x3bc   : > { %v3276_v51 = vrot.slane %v5389_v50, 7  ;;  %v2632_v56 = vpop.f32.mrb[15].mxu0 }
 0x3bd   : > { %v3313_v60 = vsel %vm3293_vm1, %v3272_v27, %v3273_v47  ;;  %v3274_v38 = vrot.slane %v2632_v56, 7 }
 0x3be   : > { %v3342_v57 = vsel %vm3259_vm2, %v3313_v60, 0.0  ;;  %v3310_v6 = vsel %vm3293_vm1, %v3275_v48, %v3276_v51 }
 0x3bf   : > { %v7072_v31 = vadd.f32 %v3342_v57, %v6950_v45  ;;  %v7075_v2 = vadd.f32 %v6952_v22, %v3310_v6  ;;  %v3311_v11 = vsel %vm3293_vm1, %v3274_v38, %v3275_v48  ;;  %v3312_v17 = vsel %vm3293_vm1, %v3273_v47, %v3274_v38 }
 0x3c0   : > { %v3344_v12 = vsel %vm3259_vm2, %v3311_v11, 0.0  ;;  %v7084_v20 = vadd.f32 %v3312_v17, %v6954_v21 }
 0x3c1   : > { %v7087_v24 = vadd.f32 %v6948_v5, %v3344_v12  ;;  %v5392_v45 = vpop.f32.mrb[16].mxu0 }
 0x3c2   : > { %v2645_v13 = vpop.f32.mrb[17].mxu0  ;;  %v3279_v27 = vrot.slane %v5392_v45, 7 }
 0x3c3   : > { %v3277_v26 = vrot.slane %v2645_v13, 7  ;;  %v5393_v22 = vpop.f32.mrb[18].mxu0 }
 0x3c4   : > { %v3280_v28 = vrot.slane %v5393_v22, 7  ;;  %v2648_v29 = vpop.f32.mrb[19].mxu0 }
 0x3c5   : > { %v3309_v33 = vsel %vm3293_vm1, %v3276_v51, %v3277_v26  ;;  %v3278_v34 = vrot.slane %v2648_v29, 7 }
 0x3c6   : > { %v3346_v30 = vsel %vm3259_vm2, %v3309_v33, 0.0  ;;  %v3306_v21 = vsel %vm3293_vm1, %v3279_v27, %v3280_v28 }
 0x3c7   : > { %v7096_v5 = vadd.f32 %v3346_v30, %v6960_v63  ;;  %v7099_v39 = vadd.f32 %v6962_v37, %v3306_v21  ;;  %v3307_v59 = vsel %vm3293_vm1, %v3278_v34, %v3279_v27  ;;  %v3308_v42 = vsel %vm3293_vm1, %v3277_v26, %v3278_v34 }
 0x3c8   : > { %v3348_v49 = vsel %vm3259_vm2, %v3307_v59, 0.0  ;;  %v7108_v46 = vadd.f32 %v3308_v42, %v6964_v0 }
 0x3c9   : > { %v7111_v47 = vadd.f32 %v6958_v62, %v3348_v49  ;;  %v5396_v63 = vpop.f32.mrb[20].mxu0 }
 0x3ca   : > { %v2661_v50 = vpop.f32.mrb[21].mxu0  ;;  %v3283_v51 = vrot.slane %v5396_v63, 7 }
 0x3cb   : > { %v3281_v48 = vrot.slane %v2661_v50, 7  ;;  %v5397_v37 = vpop.f32.mrb[22].mxu0 }
 0x3cc   : > { %v3284_v56 = vrot.slane %v5397_v37, 7  ;;  %v2664_v60 = vpop.f32.mrb[23].mxu0 }
 0x3cd   : > { %v3305_v38 = vsel %vm3293_vm1, %v3280_v28, %v3281_v48  ;;  %v3282_v57 = vrot.slane %v2664_v60, 7 }
 0x3ce   : > { %v3350_v6 = vsel %vm3259_vm2, %v3305_v38, 0.0  ;;  %v3302_v0 = vsel %vm3293_vm1, %v3283_v51, %v3284_v56 }
 0x3cf   : > { %v7120_v62 = vadd.f32 %v3350_v6, %v6969_v7  ;;  %v7123_v11 = vadd.f32 %v6971_v55, %v3302_v0  ;;  %v3303_v17 = vsel %vm3293_vm1, %v3282_v57, %v3283_v51  ;;  %v3304_v12 = vsel %vm3293_vm1, %v3281_v48, %v3282_v57 }
 0x3d0   : > { %v3352_v45 = vsel %vm3259_vm2, %v3303_v17, 0.0  ;;  %v7132_v13 = vadd.f32 %v3304_v12, %v6973_v54 }
 0x3d1   : > { %v7135_v26 = vadd.f32 %v6967_v3, %v3352_v45  ;;  %v5400_v7 = vpop.f32.mrb[24].mxu0 }
 0x3d2   : > { %v2677_v22 = vpop.f32.mrb[25].mxu0  ;;  %v3287_v28 = vrot.slane %v5400_v7, 7 }
 0x3d3   : > { %v3285_v27 = vrot.slane %v2677_v22, 7  ;;  %v5401_v55 = vpop.f32.mrb[26].mxu0 }
 0x3d4   : > { %v3288_v29 = vrot.slane %v5401_v55, 7  ;;  %v2680_v33 = vpop.f32.mrb[27].mxu0 }
 0x3d5   : > { %v3301_v34 = vsel %vm3293_vm1, %v3284_v56, %v3285_v27  ;;  %v3286_v30 = vrot.slane %v2680_v33, 7 }
 0x3d6   : > { %v3354_v21 = vsel %vm3259_vm2, %v3301_v34, 0.0  ;;  %v3298_v54 = vsel %vm3293_vm1, %v3287_v28, %v3288_v29 }
 0x3d7   : > { %v7144_v3 = vadd.f32 %v3354_v21, %v6977_v8  ;;  %v7147_v59 = vadd.f32 %v6979_v9, %v3298_v54  ;;  %v3299_v42 = vsel %vm3293_vm1, %v3286_v30, %v3287_v28  ;;  %v3300_v49 = vsel %vm3293_vm1, %v3285_v27, %v3286_v30  ;;  %v7206_v54 = vld [vmem:[%s7572_s27] ss:$0 sm:$0xff] }
 0x3d8   : > { %v3356_v63 = vsel %vm3259_vm2, %v3299_v42, 0.0  ;;  %v7156_v50 = vadd.f32 %v3300_v49, %v6981_v61 }
 0x3d9   : > { %v7159_v48 = vadd.f32 %v6975_v1, %v3356_v63  ;;  %v5404_v8 = vpop.f32.mrb[28].mxu0 }
 0x3da   : > { %v2693_v37 = vpop.f32.mrb[29].mxu0  ;;  %v3291_v56 = vrot.slane %v5404_v8, 7 }
 0x3db   : > { %v3289_v51 = vrot.slane %v2693_v37, 7  ;;  %v5405_v9 = vpop.f32.mrb[30].mxu0 }
 0x3dc   : > { %v3292_v60 = vrot.slane %v5405_v9, 7  ;;  %v2696_v38 = vpop.f32.mrb[31].mxu0 }
 0x3dd   : > { %v3297_v57 = vsel %vm3293_vm1, %v3288_v29, %v3289_v51  ;;  %v3290_v6 = vrot.slane %v2696_v38, 7 }
 0x3de   : > { %v3358_v0 = vsel %vm3259_vm2, %v3297_v57, 0.0  ;;  %v3294_v61 = vsel %vm3293_vm1, %v3291_v56, %v3292_v60  ;;  %v3325_v1 = vsel %vm3293_vm1, %v3292_v60, %v3261_v32 }
 0x3df   : > { %v7172_v17 = vadd.f32 %v3358_v0, %v6985_v14  ;;  %v3330_v12 = vsel %vm3259_vm2, %v3325_v1, 0.0  ;;  %v7177_v45 = vadd.f32 %v6987_v15, %v3294_v61  ;;  %v3295_v7 = vsel %vm3293_vm1, %v3290_v6, %v3291_v56 }
 0x3e0   : > { %v3362_v22 = vadd.f32 %v3330_v12, %v6920_v53  ;;  %v3296_v25 = vsel %vm3293_vm1, %v3289_v51, %v3290_v6  ;;  %v3360_v32 = vsel %vm3259_vm2, %v3295_v7, 0.0  ;;  %v7193_v15 = vadd.s32 8, %v6991_v23 }
 0x3e1   : > { %v7187_v14 = vadd.f32 %v3296_v25, %v6989_v16  ;;  %v7190_v27 = vadd.f32 %v6983_v10, %v3360_v32  ;;  %v5472_v55 = vpop.f32.mrb[32].mxu0 }
 0x3e2   : > { %v7195_v28 = vpop.f32.mrb[33].mxu0  ;;  %v3398_v53 = vrot.slane %v5472_v55, 1  ;;  %vm3395_vm4 = vcmp.lt.s32.totalorder %v7193_v15, 15 }
 0x3e3   : > { %v5473_v29 = vpop.f32.mrb[34].mxu0  ;;  %v3396_v30 = vrot.slane %v7195_v28, 1 }
 0x3e4   : > { %v3399_v33 = vrot.slane %v5473_v29, 1  ;;  %v3100_v34 = vpop.f32.mrb[35].mxu0 }
 0x3e5   : > { %v3397_v16 = vrot.slane %v3100_v34, 1 }
 0x3e6   : > { %v3457_v10 = vsel %vm3428_vm3, %v3398_v53, %v3399_v33 }
 0x3e7   : > { %v3499_v21 = vadd.f32 %v3457_v10, %v7015_v41  ;;  %v3458_v42 = vsel %vm3428_vm3, %v3397_v16, %v3398_v53  ;;  %v3459_v49 = vsel %vm3428_vm3, %v3396_v30, %v3397_v16 }
 0x3e8   : > { %v3466_v63 = vsel %vm3395_vm4, %v3458_v42, 0.0  ;;  %v3497_v8 = vadd.f32 %v3459_v49, %v3362_v22 }
 0x3e9   : > { %v3498_v37 = vadd.f32 %v3466_v63, %v7012_v40  ;;  %v5476_v41 = vpop.f32.mrb[36].mxu0  ;;  %v3538_v22 = vadd.f32 %v7206_v54, %v3499_v21 }
 0x3ea   : > { %v3113_v51 = vpop.f32.mrb[37].mxu0  ;;  %v3536_v9 = vadd.f32 %v7206_v54, %v3497_v8  ;;  %v3402_v57 = vrot.slane %v5476_v41, 1 }
 0x3eb   : > { %v3400_v56 = vrot.slane %v3113_v51, 1  ;;  %v5477_v60 = vpop.f32.mrb[38].mxu0  ;;  %v3537_v38 = vadd.f32 %v7206_v54, %v3498_v37  ;;  %v3570_v49 = vmax.f32 %v3538_v22, 0.0 }
 0x3ec   : > { %v3403_v6 = vrot.slane %v5477_v60, 1  ;;  %v3116_v0 = vpop.f32.mrb[39].mxu0  ;;  %v3568_v61 = vmax.f32 %v3536_v9, 0.0 }
 0x3ed   : > { %v3456_v1 = vsel %vm3428_vm3, %v3399_v33, %v3400_v56  ;;  %v3401_v12 = vrot.slane %v3116_v0, 1  ;;  %v3569_v7 = vmax.f32 %v3537_v38, 0.0 }
 0x3ee   : > { %v3468_v40 = vsel %vm3395_vm4, %v3456_v1, 0.0  ;;  %v3453_v25 = vsel %vm3428_vm3, %v3402_v57, %v3403_v6 }
 0x3ef   : > { %v3500_v32 = vadd.f32 %v3468_v40, %v7001_v35  ;;  %v3503_v55 = vadd.f32 %v3453_v25, %v7039_v19  ;;  %v3454_v29 = vsel %vm3428_vm3, %v3401_v12, %v3402_v57  ;;  %v3455_v53 = vsel %vm3428_vm3, %v3400_v56, %v3401_v12 }
 0x3f0   : > { %v3470_v33 = vsel %vm3395_vm4, %v3454_v29, 0.0  ;;  %v3501_v34 = vadd.f32 %v3455_v53, %v7024_v52  ;;  %v3600_v16 = vpack.c.bf16 %v3569_v7, %v3568_v61 }
 0x3f1   : > { %v3539_v10 = vadd.f32 %v7206_v54, %v3500_v32  ;;  %v3502_v21 = vadd.f32 %v3470_v33, %v7036_v18  ;;  %v5480_v42 = vpop.f32.mrb[40].mxu0  ;;  %v3542_v1 = vadd.f32 %v7206_v54, %v3503_v55 }
 0x3f2   : > { %5518 = vmatprep.mubr.bf16.mxu1 %v3600_v16  ;;  %v3129_v35 = vpop.f32.mrb[41].mxu0  ;;  %v3540_v19 = vadd.f32 %v7206_v54, %v3501_v34  ;;  %v3406_v51 = vrot.slane %v5480_v42, 1 }
 0x3f3   : > { %v3571_v63 = vmax.f32 %v3539_v10, 0.0  ;;  %v3404_v8 = vrot.slane %v3129_v35, 1  ;;  %v5481_v37 = vpop.f32.mrb[42].mxu0  ;;  %v3541_v41 = vadd.f32 %v7206_v54, %v3502_v21  ;;  %v3574_v16 = vmax.f32 %v3542_v1, 0.0 }
 0x3f4   : > { %v3407_v9 = vrot.slane %v5481_v37, 1  ;;  %v3132_v56 = vpop.f32.mrb[43].mxu0  ;;  %v3572_v52 = vmax.f32 %v3540_v19, 0.0 }
 0x3f5   : > { %v3601_v60 = vpack.c.bf16 %v3571_v63, %v3570_v49  ;;  %v3452_v38 = vsel %vm3428_vm3, %v3403_v6, %v3404_v8  ;;  %v3405_v18 = vrot.slane %v3132_v56, 1  ;;  %v3573_v57 = vmax.f32 %v3541_v41, 0.0 }
 0x3f6   : > { %v3472_v0 = vsel %vm3395_vm4, %v3452_v38, 0.0  ;;  %v3449_v61 = vsel %vm3428_vm3, %v3406_v51, %v3407_v9 }
 0x3f7   : > { %v3504_v12 = vadd.f32 %v3472_v0, %v7027_v4  ;;  %v3507_v7 = vadd.f32 %v3449_v61, %v7063_v44  ;;  %v3450_v22 = vsel %vm3428_vm3, %v3405_v18, %v3406_v51  ;;  %v3451_v6 = vsel %vm3428_vm3, %v3404_v8, %v3405_v18  ;;  %5519 = vmatmul.mubr.bf16.vlgmr.msra.gmra.mrb[72].mxu1 %v3601_v60 }
 0x3f8   : > { %v3474_v40 = vsel %vm3395_vm4, %v3450_v22, 0.0  ;;  %v3505_v25 = vadd.f32 %v3451_v6, %v7048_v58  ;;  %v3602_v32 = vpack.c.bf16 %v3573_v57, %v3572_v52 }
 0x3f9   : > { %v3506_v29 = vadd.f32 %v3474_v40, %v7060_v43  ;;  %v5484_v55 = vpop.f32.mrb[44].mxu0  ;;  %v3543_v4 = vadd.f32 %v7206_v54, %v3504_v12  ;;  %v3546_v51 = vadd.f32 %v7206_v54, %v3507_v7 }
 0x3fa   : > { %5522 = vmatprep.mubr.bf16.mxu1 %v3602_v32  ;;  %v3145_v44 = vpop.f32.mrb[45].mxu0  ;;  %v3544_v53 = vadd.f32 %v7206_v54, %v3505_v25  ;;  %v3410_v42 = vrot.slane %v5484_v55, 1 }
 0x3fb   : > { %v3408_v33 = vrot.slane %v3145_v44, 1  ;;  %v5485_v34 = vpop.f32.mrb[46].mxu0  ;;  %v3575_v10 = vmax.f32 %v3543_v4, 0.0  ;;  %v3545_v21 = vadd.f32 %v7206_v54, %v3506_v29  ;;  %v3578_v22 = vmax.f32 %v3546_v51, 0.0 }
 0x3fc   : > { %v3411_v35 = vrot.slane %v5485_v34, 1  ;;  %v3148_v19 = vpop.f32.mrb[47].mxu0  ;;  %v3576_v58 = vmax.f32 %v3544_v53, 0.0 }
 0x3fd   : > { %v3448_v43 = vsel %vm3428_vm3, %v3407_v9, %v3408_v33  ;;  %v3409_v49 = vrot.slane %v3148_v19, 1  ;;  %v3603_v63 = vpack.c.bf16 %v3575_v10, %v3574_v16  ;;  %v3577_v8 = vmax.f32 %v3545_v21, 0.0 }
 0x3fe   : > { %v3476_v37 = vsel %vm3395_vm4, %v3448_v43, 0.0  ;;  %v3445_v41 = vsel %vm3428_vm3, %v3410_v42, %v3411_v35 }
 0x3ff   : > { %v3508_v56 = vadd.f32 %v3476_v37, %v7051_v36  ;;  %v3511_v52 = vadd.f32 %v3445_v41, %v7087_v24  ;;  %v3446_v60 = vsel %vm3428_vm3, %v3409_v49, %v3410_v42  ;;  %v3447_v9 = vsel %vm3428_vm3, %v3408_v33, %v3409_v49  ;;  %5523 = vmatmul.mubr.bf16.gmra.mrb[76].mxu1 %v3603_v63 }
 0x400   : > { %v3478_v38 = vsel %vm3395_vm4, %v3446_v60, 0.0  ;;  %v3509_v18 = vadd.f32 %v3447_v9, %v7072_v31  ;;  %v3604_v57 = vpack.c.bf16 %v3577_v8, %v3576_v58 }
 0x401   : > { %v3510_v0 = vadd.f32 %v3478_v38, %v7084_v20  ;;  %v5488_v61 = vpop.f32.mrb[48].mxu0  ;;  %v3547_v36 = vadd.f32 %v7206_v54, %v3508_v56  ;;  %v3550_v34 = vadd.f32 %v7206_v54, %v3511_v52 }
 0x402   : > { %5526 = vmatprep.mubr.bf16.mxu1 %v3604_v57  ;;  %v3161_v24 = vpop.f32.mrb[49].mxu0  ;;  %v3548_v1 = vadd.f32 %v7206_v54, %v3509_v18  ;;  %v3414_v25 = vrot.slane %v5488_v61, 1 }
 0x403   : > { %v3412_v12 = vrot.slane %v3161_v24, 1  ;;  %v5489_v7 = vpop.f32.mrb[50].mxu0  ;;  %v3579_v6 = vmax.f32 %v3547_v36, 0.0  ;;  %v3549_v40 = vadd.f32 %v7206_v54, %v3510_v0  ;;  %v3582_v41 = vmax.f32 %v3550_v34, 0.0 }
 0x404   : > { %v3415_v32 = vrot.slane %v5489_v7, 1  ;;  %v3164_v29 = vpop.f32.mrb[51].mxu0  ;;  %v3580_v31 = vmax.f32 %v3548_v1, 0.0 }
 0x405   : > { %v3444_v20 = vsel %vm3428_vm3, %v3411_v35, %v3412_v12  ;;  %v3413_v55 = vrot.slane %v3164_v29, 1  ;;  %v3605_v4 = vpack.c.bf16 %v3579_v6, %v3578_v22  ;;  %v3581_v44 = vmax.f32 %v3549_v40, 0.0 }
 0x406   : > { %v3480_v53 = vsel %vm3395_vm4, %v3444_v20, 0.0  ;;  %v3441_v33 = vsel %vm3428_vm3, %v3414_v25, %v3415_v32 }
 0x407   : > { %v3512_v16 = vadd.f32 %v3480_v53, %v7075_v2  ;;  %v3515_v10 = vadd.f32 %v3441_v33, %v7111_v47  ;;  %v3442_v21 = vsel %vm3428_vm3, %v3413_v55, %v3414_v25  ;;  %v3443_v42 = vsel %vm3428_vm3, %v3412_v12, %v3413_v55  ;;  %5527 = vmatmul.mubr.bf16.gmra.mrb[80].mxu1 %v3605_v4 }
 0x408   : > { %v3482_v35 = vsel %vm3395_vm4, %v3442_v21, 0.0  ;;  %v3513_v19 = vadd.f32 %v3443_v42, %v7096_v5  ;;  %v3606_v58 = vpack.c.bf16 %v3581_v44, %v3580_v31 }
 0x409   : > { %v3514_v43 = vadd.f32 %v3482_v35, %v7108_v46  ;;  %v5492_v49 = vpop.f32.mrb[52].mxu0  ;;  %v3551_v2 = vadd.f32 %v7206_v54, %v3512_v16  ;;  %v3554_v36 = vadd.f32 %v7206_v54, %v3515_v10 }
 0x40a   : > { %5530 = vmatprep.mubr.bf16.mxu1 %v3606_v58  ;;  %v3177_v47 = vpop.f32.mrb[53].mxu0  ;;  %v3552_v63 = vadd.f32 %v7206_v54, %v3513_v19  ;;  %v3418_v52 = vrot.slane %v5492_v49, 1 }
 0x40b   : > { %v3416_v8 = vrot.slane %v3177_v47, 1  ;;  %v5493_v37 = vpop.f32.mrb[54].mxu0  ;;  %v3583_v51 = vmax.f32 %v3551_v2, 0.0  ;;  %v3553_v56 = vadd.f32 %v7206_v54, %v3514_v43  ;;  %v3586_v55 = vmax.f32 %v3554_v36, 0.0 }
 0x40c   : > { %v3419_v60 = vrot.slane %v5493_v37, 1  ;;  %v3180_v9 = vpop.f32.mrb[55].mxu0  ;;  %v3584_v5 = vmax.f32 %v3552_v63, 0.0 }
 0x40d   : > { %v3440_v46 = vsel %vm3428_vm3, %v3415_v32, %v3416_v8  ;;  %v3417_v38 = vrot.slane %v3180_v9, 1  ;;  %v3607_v18 = vpack.c.bf16 %v3583_v51, %v3582_v41  ;;  %v3585_v57 = vmax.f32 %v3553_v56, 0.0 }
 0x40e   : > { %v3484_v0 = vsel %vm3395_vm4, %v3440_v46, 0.0  ;;  %v3437_v61 = vsel %vm3428_vm3, %v3418_v52, %v3419_v60 }
 0x40f   : > { %v3516_v24 = vadd.f32 %v3484_v0, %v7099_v39  ;;  %v3519_v1 = vadd.f32 %v3437_v61, %v7135_v26  ;;  %v3438_v12 = vsel %vm3428_vm3, %v3417_v38, %v3418_v52  ;;  %v3439_v7 = vsel %vm3428_vm3, %v3416_v8, %v3417_v38  ;;  %5531 = vmatmul.mubr.bf16.gmra.mrb[84].mxu1 %v3607_v18 }
 0x410   : > { %v3486_v22 = vsel %vm3395_vm4, %v3438_v12, 0.0  ;;  %v3517_v6 = vadd.f32 %v3439_v7, %v7120_v62  ;;  %v3608_v40 = vpack.c.bf16 %v3585_v57, %v3584_v5 }
 0x411   : > { %v3518_v25 = vadd.f32 %v3486_v22, %v7132_v13  ;;  %v5496_v32 = vpop.f32.mrb[56].mxu0  ;;  %v3555_v39 = vadd.f32 %v7206_v54, %v3516_v24  ;;  %v3558_v19 = vadd.f32 %v7206_v54, %v3519_v1 }
 0x412   : > { %5534 = vmatprep.mubr.bf16.mxu1 %v3608_v40  ;;  %v3193_v26 = vpop.f32.mrb[57].mxu0  ;;  %v3556_v29 = vadd.f32 %v7206_v54, %v3517_v6  ;;  %v3422_v53 = vrot.slane %v5496_v32, 1 }
 0x413   : > { %v3420_v31 = vrot.slane %v3193_v26, 1  ;;  %v5497_v20 = vpop.f32.mrb[58].mxu0  ;;  %v3587_v4 = vmax.f32 %v3555_v39, 0.0  ;;  %v3557_v44 = vadd.f32 %v7206_v54, %v3518_v25 }
 0x414   : > { %v3423_v33 = vrot.slane %v5497_v20, 1  ;;  %v3196_v34 = vpop.f32.mrb[59].mxu0  ;;  %v3588_v62 = vmax.f32 %v3556_v29, 0.0 }
 0x415   : > { %v3436_v13 = vsel %vm3428_vm3, %v3419_v60, %v3420_v31  ;;  %v3421_v16 = vrot.slane %v3196_v34, 1  ;;  %v3609_v10 = vpack.c.bf16 %v3587_v4, %v3586_v55  ;;  %v3589_v21 = vmax.f32 %v3557_v44, 0.0  ;;  %v4526_v34 = vld [vmem:[%s6598_s19] sm:$0xff]  }
 0x416   : > { %v3488_v42 = vsel %vm3395_vm4, %v3436_v13, 0.0  ;;  %v3433_v35 = vsel %vm3428_vm3, %v3422_v53, %v3423_v33  ;;  %v3590_v60 = vmax.f32 %v3558_v19, 0.0 }
 0x417   : > { %v3520_v58 = vadd.f32 %v3488_v42, %v7123_v11  ;;  %v3523_v43 = vadd.f32 %v3433_v35, %v7159_v48  ;;  %v3434_v49 = vsel %vm3428_vm3, %v3421_v16, %v3422_v53  ;;  %v3435_v2 = vsel %vm3428_vm3, %v3420_v31, %v3421_v16  ;;  %5535 = vmatmul.mubr.bf16.gmra.mrb[88].mxu1 %v3609_v10 }
 0x418   : > { %v3490_v47 = vsel %vm3395_vm4, %v3434_v49, 0.0  ;;  %v3521_v63 = vadd.f32 %v3435_v2, %v7144_v3  ;;  %v3610_v8 = vpack.c.bf16 %v3589_v21, %v3588_v62  ;;  %v7373_v62 = vld [vmem:[%s7573_s22] ss:$0 sm:$0xff]  ;;  %v4527_v16 = vunpack.c.l.bf16 %v4526_v34 }
 0x419   : > { %v3522_v37 = vadd.f32 %v3490_v47, %v7156_v50  ;;  %v5500_v41 = vpop.f32.mrb[60].mxu0  ;;  %v3559_v11 = vadd.f32 %v7206_v54, %v3520_v58  ;;  %v3562_v12 = vadd.f32 %v7206_v54, %v3523_v43  ;;  %v4528_v58 = vunpack.c.h.bf16 %v4526_v34  ;;  %v4676_v34 = vld [vmem:[%s6598_s19 + $0x38] sm:$0xff]  }
 0x41a   : > { %5538 = vmatprep.mubr.bf16.mxu1 %v3610_v8  ;;  %v3209_v48 = vpop.f32.mrb[61].mxu0  ;;  %v3560_v51 = vadd.f32 %v7206_v54, %v3521_v63  ;;  %v3426_v46 = vrot.slane %v5500_v41, 1  ;;  %v4672_v8 = vld [vmem:[%s6598_s19 + $0x18] sm:$0xff]   ;;  %v4671_v41 = vld [vmem:[%s6598_s19 + $0x10] sm:$0xff]  }
 0x41b   : > { %v3424_v56 = vrot.slane %v3209_v48, 1  ;;  %v5501_v52 = vpop.f32.mrb[62].mxu0  ;;  %v3591_v9 = vmax.f32 %v3559_v11, 0.0  ;;  %v3561_v5 = vadd.f32 %v7206_v54, %v3522_v37  ;;  %v3594_v29 = vmax.f32 %v3562_v12, 0.0 }
 0x41c   : > { %v3427_v38 = vrot.slane %v5501_v52, 1  ;;  %v3212_v18 = vpop.f32.mrb[63].mxu0  ;;  %v3592_v3 = vmax.f32 %v3560_v51, 0.0 }
 0x41d   : > { %v3432_v50 = vsel %vm3428_vm3, %v3423_v33, %v3424_v56  ;;  %v3425_v57 = vrot.slane %v3212_v18, 1  ;;  %v3611_v0 = vpack.c.bf16 %v3591_v9, %v3590_v60  ;;  %v3593_v61 = vmax.f32 %v3561_v5, 0.0  ;;  %v4670_v33 = vld [vmem:[%s6598_s19 + $0x8] sm:$0xff]  }
 0x41e   : > { %v3492_v36 = vsel %vm3395_vm4, %v3432_v50, 0.0  ;;  %v3429_v24 = vsel %vm3428_vm3, %v3426_v46, %v3427_v38  ;;  %v3460_v1 = vsel %vm3428_vm3, %v3427_v38, %v3396_v30  ;;  %v4531_v13 = vunpack.c.l.bf16 %v4670_v33 }
 0x41f   : > { %v3524_v7 = vadd.f32 %v3492_v36, %v7147_v59  ;;  %v3496_v22 = vsel %vm3395_vm4, %v3460_v1, 0.0  ;;  %v3527_v6 = vadd.f32 %v3429_v24, %v7190_v27  ;;  %v3430_v40 = vsel %vm3428_vm3, %v3425_v57, %v3426_v46  ;;  %5539 = vmatmul.mubr.bf16.gmra.mrb[92].mxu1 %v3611_v0 }
 0x420   : > { %v3528_v25 = vadd.f32 %v3496_v22, %v7177_v45  ;;  %v3431_v28 = vsel %vm3428_vm3, %v3424_v56, %v3425_v57  ;;  %v3494_v30 = vsel %vm3395_vm4, %v3430_v40, 0.0  ;;  %v3612_v32 = vpack.c.bf16 %v3593_v61, %v3592_v3  ;;  %v4674_v22 = vld [vmem:[%s6598_s19 + $0x28] sm:$0xff]   ;;  %v4673_v40 = vld [vmem:[%s6598_s19 + $0x20] sm:$0xff]  }
 0x421   : > { %v3525_v59 = vadd.f32 %v3431_v28, %v7172_v17  ;;  %v3526_v39 = vadd.f32 %v3494_v30, %v7187_v14  ;;  %v3563_v26 = vadd.f32 %v7206_v54, %v3524_v7  ;;  %v3566_v27 = vadd.f32 %v7206_v54, %v3527_v6 }
 0x422   : > { %5542 = vmatprep.mubr.bf16.mxu1 %v3612_v32  ;;  %v3567_v45 = vadd.f32 %v7206_v54, %v3528_v25  ;;  %v4532_v42 = vunpack.c.h.bf16 %v4670_v33  ;;  %v4539_v56 = vunpack.c.l.bf16 %v4672_v8  ;;  %v4535_v5 = vunpack.c.l.bf16 %v4671_v41 }
 0x423   : > { %v3595_v23 = vmax.f32 %v3563_v26, 0.0  ;;  %v3564_v31 = vadd.f32 %v7206_v54, %v3525_v59  ;;  %v3565_v15 = vadd.f32 %v7206_v54, %v3526_v39  ;;  %v3598_v20 = vmax.f32 %v3566_v27, 0.0 }
 0x424   : > { %v3599_v55 = vmax.f32 %v3567_v45, 0.0  ;;  %v4540_v3 = vunpack.c.h.bf16 %v4672_v8  ;;  %v4536_v61 = vunpack.c.h.bf16 %v4671_v41  ;;  %v4547_v32 = vunpack.c.l.bf16 %v4674_v22 }
 0x425   : > { %v3613_v17 = vpack.c.bf16 %v3595_v23, %v3594_v29  ;;  %v3596_v4 = vmax.f32 %v3564_v31, 0.0  ;;  %v3597_v14 = vmax.f32 %v3565_v15, 0.0  ;;  %v4543_v27 = vunpack.c.l.bf16 %v4673_v40 }
 0x426   : > { %v3615_v44 = vpack.c.bf16 %v3599_v55, %v3598_v20  ;;  %v4548_v31 = vunpack.c.h.bf16 %v4674_v22 }
 0x427   : > { %5543 = vmatmul.mubr.bf16.gmra.mrb[96].mxu1 %v3613_v17  ;;  %v3614_v53 = vpack.c.bf16 %v3597_v14, %v3596_v4  ;;  %v4544_v17 = vunpack.c.h.bf16 %v4673_v40 }
 0x429   : > { %5546 = vmatprep.mubr.bf16.mxu1 %v3614_v53 }
 0x42f   : > { %5547 = vmatmul.mubr.bf16.gmra.mrb[100].mxu1 %v3615_v44 }
 0x4ca   : > { %v5520_v54 = vpop.f32.mrb[72].mxu1 }
 0x4cb   : > { %v3730_v10 = vadd.f32 %v5520_v54, %v7373_v62  ;;  %v3721_v21 = vpop.f32.mrb[73].mxu1  ;;  %v4675_v54 = vld [vmem:[%s6598_s19 + $0x30] sm:$0xff]  }
 0x4cc   : > { %v3722_v35 = vadd.f32 %v7373_v62, %v3721_v21  ;;  %v5521_v19 = vpop.f32.mrb[74].mxu1 }
 0x4cd   : > { %v3914_v43 = vadd.f32 %v4531_v13, %v3730_v10  ;;  %v3733_v49 = vadd.f32 %v5521_v19, %v7373_v62  ;;  %v3724_v2 = vpop.f32.mrb[75].mxu1 }
 0x4ce   : > { %v3912_v47 = vadd.f32 %v4527_v16, %v3722_v35  ;;  %v3725_v63 = vadd.f32 %v7373_v62, %v3724_v2 }
 0x4cf   : > { %v3915_v37 = vadd.f32 %v4532_v42, %v3733_v49  ;;  %v3946_v48 = vmax.f32 %v3914_v43, 0.0  ;;  %v4555_v42 = vunpack.c.l.bf16 %v4676_v34  ;;  %v4551_v43 = vunpack.c.l.bf16 %v4675_v54 }
 0x4d0   : > { %v3913_v11 = vadd.f32 %v4528_v58, %v3725_v63  ;;  %v3944_v52 = vmax.f32 %v3912_v47, 0.0  ;;  %v4556_v63 = vunpack.c.h.bf16 %v4676_v34 }
 0x4d1   : > { %v3947_v51 = vmax.f32 %v3915_v37, 0.0 }
 0x4d2   : > { %v3945_v60 = vmax.f32 %v3913_v11, 0.0  ;;  %v5524_v9 = vpop.f32.mrb[76].mxu1  ;;  %v4552_v11 = vunpack.c.h.bf16 %v4675_v54 }
 0x4d3   : > { %v4597_v46 = vpack.c.bf16 %v3947_v51, %v3946_v48  ;;  %v3746_v38 = vadd.f32 %v5524_v9, %v7373_v62  ;;  %v3737_v18 = vpop.f32.mrb[77].mxu1  ;;  %v4678_v9 = vld [vmem:[%s6598_s19 + $0x48] sm:$0xff]  }
 0x4d4   : > { %v4592_v50 = vpack.c.bf16 %v3945_v60, %v3944_v52  ;;  %v3738_v57 = vadd.f32 %v7373_v62, %v3737_v18  ;;  %v5525_v0 = vpop.f32.mrb[78].mxu1 }
 0x4d5   : > { %4685 = vst [vmem:[%s7385_s9 + $0x8] sm:$0xff] %v4597_v46   ;;  %v3918_v36 = vadd.f32 %v4539_v56, %v3746_v38  ;;  %v3749_v24 = vadd.f32 %v5525_v0, %v7373_v62  ;;  %v3740_v1 = vpop.f32.mrb[79].mxu1  ;;  %v4677_v46 = vld [vmem:[%s6598_s19 + $0x40] sm:$0xff]  }
 0x4d6   : > { %4593 = vst [vmem:[%s7385_s9] sm:$0xff] %v4592_v50   ;;  %v3916_v12 = vadd.f32 %v4535_v5, %v3738_v57  ;;  %v3741_v7 = vadd.f32 %v7373_v62, %v3740_v1  ;;  %v4563_v50 = vunpack.c.l.bf16 %v4678_v9 }
 0x4d7   : > { %v3919_v6 = vadd.f32 %v4540_v3, %v3749_v24  ;;  %v3950_v28 = vmax.f32 %v3918_v36, 0.0  ;;  %v4559_v36 = vunpack.c.l.bf16 %v4677_v46 }
 0x4d8   : > { %v3917_v25 = vadd.f32 %v4536_v61, %v3741_v7  ;;  %v3948_v59 = vmax.f32 %v3916_v12, 0.0  ;;  %v4564_v7 = vunpack.c.h.bf16 %v4678_v9 }
 0x4d9   : > { %v3951_v30 = vmax.f32 %v3919_v6, 0.0 }
 0x4da   : > { %v3949_v39 = vmax.f32 %v3917_v25, 0.0  ;;  %v5528_v26 = vpop.f32.mrb[80].mxu1  ;;  %v4560_v25 = vunpack.c.h.bf16 %v4677_v46 }
 0x4db   : > { %v4607_v29 = vpack.c.bf16 %v3951_v30, %v3950_v28  ;;  %v3762_v45 = vadd.f32 %v5528_v26, %v7373_v62  ;;  %v3753_v23 = vpop.f32.mrb[81].mxu1  ;;  %v4680_v26 = vld [vmem:[%s6598_s19 + $0x58] sm:$0xff]  }
 0x4dc   : > { %v4602_v15 = vpack.c.bf16 %v3949_v39, %v3948_v59  ;;  %v3754_v20 = vadd.f32 %v7373_v62, %v3753_v23  ;;  %v5529_v55 = vpop.f32.mrb[82].mxu1 }
 0x4dd   : > { %4687 = vst [vmem:[%s7385_s9 + $0x18] sm:$0xff] %v4607_v29   ;;  %v3922_v4 = vadd.f32 %v4547_v32, %v3762_v45  ;;  %v3765_v14 = vadd.f32 %v5529_v55, %v7373_v62  ;;  %v3756_v44 = vpop.f32.mrb[83].mxu1  ;;  %v4679_v29 = vld [vmem:[%s6598_s19 + $0x50] sm:$0xff]  }
 0x4de   : > { %4686 = vst [vmem:[%s7385_s9 + $0x10] sm:$0xff] %v4602_v15   ;;  %v3920_v53 = vadd.f32 %v4543_v27, %v3754_v20  ;;  %v3757_v33 = vadd.f32 %v7373_v62, %v3756_v44  ;;  %v4571_v15 = vunpack.c.l.bf16 %v4680_v26 }
 0x4df   : > { %v3923_v13 = vadd.f32 %v4548_v31, %v3765_v14  ;;  %v3954_v10 = vmax.f32 %v3922_v4, 0.0  ;;  %v4567_v4 = vunpack.c.l.bf16 %v4679_v29 }
 0x4e0   : > { %v3921_v16 = vadd.f32 %v4544_v17, %v3757_v33  ;;  %v3952_v35 = vmax.f32 %v3920_v53, 0.0  ;;  %v4572_v33 = vunpack.c.h.bf16 %v4680_v26 }
 0x4e1   : > { %v3955_v21 = vmax.f32 %v3923_v13, 0.0 }
 0x4e2   : > { %v3953_v19 = vmax.f32 %v3921_v16, 0.0  ;;  %v5532_v58 = vpop.f32.mrb[84].mxu1  ;;  %v4568_v16 = vunpack.c.h.bf16 %v4679_v29 }
 0x4e3   : > { %v4617_v49 = vpack.c.bf16 %v3955_v21, %v3954_v10  ;;  %v3778_v2 = vadd.f32 %v5532_v58, %v7373_v62  ;;  %v3769_v47 = vpop.f32.mrb[85].mxu1  ;;  %v4682_v58 = vld [vmem:[%s6598_s19 + $0x68] sm:$0xff]  }
 0x4e4   : > { %v4612_v8 = vpack.c.bf16 %v3953_v19, %v3952_v35  ;;  %v3770_v37 = vadd.f32 %v7373_v62, %v3769_v47  ;;  %v5533_v41 = vpop.f32.mrb[86].mxu1 }
 0x4e5   : > { %4689 = vst [vmem:[%s7385_s9 + $0x28] sm:$0xff] %v4617_v49   ;;  %v3926_v48 = vadd.f32 %v4555_v42, %v3778_v2  ;;  %v3781_v51 = vadd.f32 %v5533_v41, %v7373_v62  ;;  %v3772_v56 = vpop.f32.mrb[87].mxu1  ;;  %v4681_v49 = vld [vmem:[%s6598_s19 + $0x60] sm:$0xff]  }
 0x4e6   : > { %4688 = vst [vmem:[%s7385_s9 + $0x20] sm:$0xff] %v4612_v8   ;;  %v3924_v52 = vadd.f32 %v4551_v43, %v3770_v37  ;;  %v3773_v60 = vadd.f32 %v7373_v62, %v3772_v56  ;;  %v4579_v8 = vunpack.c.l.bf16 %v4682_v58 }
 0x4e7   : > { %v3927_v5 = vadd.f32 %v4556_v63, %v3781_v51  ;;  %v3958_v18 = vmax.f32 %v3926_v48, 0.0  ;;  %v4575_v48 = vunpack.c.l.bf16 %v4681_v49 }
 0x4e8   : > { %v3925_v38 = vadd.f32 %v4552_v11, %v3773_v60  ;;  %v3956_v57 = vmax.f32 %v3924_v52, 0.0  ;;  %v4580_v60 = vunpack.c.h.bf16 %v4682_v58 }
 0x4e9   : > { %v3959_v3 = vmax.f32 %v3927_v5, 0.0 }
 0x4ea   : > { %v3957_v0 = vmax.f32 %v3925_v38, 0.0  ;;  %v5536_v61 = vpop.f32.mrb[88].mxu1  ;;  %v4576_v38 = vunpack.c.h.bf16 %v4681_v49 }
 0x4eb   : > { %v4627_v24 = vpack.c.bf16 %v3959_v3, %v3958_v18  ;;  %v3794_v1 = vadd.f32 %v5536_v61, %v7373_v62  ;;  %v3785_v12 = vpop.f32.mrb[89].mxu1  ;;  %v4684_v61 = vld [vmem:[%s6598_s19 + $0x78] sm:$0xff]  }
 0x4ec   : > { %v4622_v22 = vpack.c.bf16 %v3957_v0, %v3956_v57  ;;  %v3786_v6 = vadd.f32 %v7373_v62, %v3785_v12  ;;  %v5537_v40 = vpop.f32.mrb[90].mxu1 }
 0x4ed   : > { %4691 = vst [vmem:[%s7385_s9 + $0x38] sm:$0xff] %v4627_v24   ;;  %v3930_v28 = vadd.f32 %v4563_v50, %v3794_v1  ;;  %v3797_v30 = vadd.f32 %v5537_v40, %v7373_v62  ;;  %v3788_v32 = vpop.f32.mrb[91].mxu1  ;;  %v4683_v24 = vld [vmem:[%s6598_s19 + $0x70] sm:$0xff]   ;;  %s6132_s19 = scalar_lea.vmem %s7446_s16, 2048 }
 0x4ee   : > { %4690 = vst [vmem:[%s7385_s9 + $0x30] sm:$0xff] %v4622_v22   ;;  %v3928_v59 = vadd.f32 %v4559_v36, %v3786_v6  ;;  %v3789_v39 = vadd.f32 %v7373_v62, %v3788_v32  ;;  %v4587_v22 = vunpack.c.l.bf16 %v4684_v61  ;;  %p6133_p11 = scmp.ne.s32.totalorder %s7446_s16, %s6132_s19  ;;  %p6140_p5 = scmp.lt.s32.totalorder %s6138_s21, %s6132_s19 }
 0x4ef   : > { %v3931_v27 = vadd.f32 %v4564_v7, %v3797_v30  ;;  %v3962_v23 = vmax.f32 %v3930_v28, 0.0  ;;  %v4583_v28 = vunpack.c.l.bf16 %v4683_v24 }
 0x4f0   : > { %v3929_v45 = vadd.f32 %v4560_v25, %v3789_v39  ;;  %v3960_v20 = vmax.f32 %v3928_v59, 0.0  ;;  %v4588_v39 = vunpack.c.h.bf16 %v4684_v61  ;;  %p6134_p1 = pnand %p6133_p11, %p7577_p10  ;;  %p6141_p3 = por %p6140_p5, %p6139_p13 }
 0x4f1   : > { %v3963_v31 = vmax.f32 %v3931_v27, 0.0 }
 0x4f2   : > { %v3961_v55 = vmax.f32 %v3929_v45, 0.0  ;;  %v5540_v17 = vpop.f32.mrb[92].mxu1  ;;  %v4584_v45 = vunpack.c.h.bf16 %v4683_v24  ;;  %p6135_p8 = pneg %p6134_p1 }
 0x4f3   : > { %v4637_v14 = vpack.c.bf16 %v3963_v31, %v3962_v23  ;;  %v3810_v44 = vadd.f32 %v5540_v17, %v7373_v62  ;;  %v3801_v53 = vpop.f32.mrb[93].mxu1 }
 0x4f4   : > { %v4632_v34 = vpack.c.bf16 %v3961_v55, %v3960_v20  ;;  %v3802_v13 = vadd.f32 %v7373_v62, %v3801_v53  ;;  %v5541_v54 = vpop.f32.mrb[94].mxu1  ;;  %p6142_p6 = pnand %p6141_p3, %p6135_p8 }
 0x4f5   : > { %4693 = vst [vmem:[%s7385_s9 + $0x48] sm:$0xff] %v4637_v14   ;;  %v3934_v10 = vadd.f32 %v4571_v15, %v3810_v44  ;;  %v3813_v21 = vadd.f32 %v5541_v54, %v7373_v62  ;;  %v3804_v42 = vpop.f32.mrb[95].mxu1 }
 0x4f6   : > { %4692 = vst [vmem:[%s7385_s9 + $0x40] sm:$0xff] %v4632_v34   ;;  %v3932_v35 = vadd.f32 %v4567_v4, %v3802_v13  ;;  %v3805_v19 = vadd.f32 %v7373_v62, %v3804_v42 }
 0x4f7   : > { %v3935_v43 = vadd.f32 %v4572_v33, %v3813_v21  ;;  %v3966_v47 = vmax.f32 %v3934_v10, 0.0 }
 0x4f8   : > { %v3933_v2 = vadd.f32 %v4568_v16, %v3805_v19  ;;  %v3964_v37 = vmax.f32 %v3932_v35, 0.0 }
 0x4f9   : > { %v3967_v63 = vmax.f32 %v3935_v43, 0.0 }
 0x4fa   : > { %v3965_v41 = vmax.f32 %v3933_v2, 0.0  ;;  %v5544_v11 = vpop.f32.mrb[96].mxu1 }
 0x4fb   : > { %v4647_v51 = vpack.c.bf16 %v3967_v63, %v3966_v47  ;;  %v3826_v56 = vadd.f32 %v5544_v11, %v7373_v62  ;;  %v3817_v52 = vpop.f32.mrb[97].mxu1 }
 0x4fc   : > { %v4642_v9 = vpack.c.bf16 %v3965_v41, %v3964_v37  ;;  %v3818_v5 = vadd.f32 %v7373_v62, %v3817_v52  ;;  %v5545_v46 = vpop.f32.mrb[98].mxu1 }
 0x4fd   : > { %4695 = vst [vmem:[%s7385_s9 + $0x58] sm:$0xff] %v4647_v51   ;;  %v3938_v18 = vadd.f32 %v4579_v8, %v3826_v56  ;;  %v3829_v3 = vadd.f32 %v5545_v46, %v7373_v62  ;;  %v3820_v50 = vpop.f32.mrb[99].mxu1 }
 0x4fe   : > { %4694 = vst [vmem:[%s7385_s9 + $0x50] sm:$0xff] %v4642_v9   ;;  %v3936_v57 = vadd.f32 %v4575_v48, %v3818_v5  ;;  %v3821_v0 = vadd.f32 %v7373_v62, %v3820_v50 }
 0x4ff   : > { %v3939_v36 = vadd.f32 %v4580_v60, %v3829_v3  ;;  %v3970_v12 = vmax.f32 %v3938_v18, 0.0 }
 0x500   : > { %v3937_v1 = vadd.f32 %v4576_v38, %v3821_v0  ;;  %v3968_v6 = vmax.f32 %v3936_v57, 0.0 }
 0x501   : > { %v3971_v7 = vmax.f32 %v3939_v36, 0.0 }
 0x502   : > { %v3969_v40 = vmax.f32 %v3937_v1, 0.0  ;;  %v5548_v25 = vpop.f32.mrb[100].mxu1 }
 0x503   : > { %v4657_v30 = vpack.c.bf16 %v3971_v7, %v3970_v12  ;;  %v3842_v32 = vadd.f32 %v5548_v25, %v7373_v62  ;;  %v3833_v59 = vpop.f32.mrb[101].mxu1 }
 0x504   : > { %v4652_v26 = vpack.c.bf16 %v3969_v40, %v3968_v6  ;;  %v3834_v27 = vadd.f32 %v7373_v62, %v3833_v59  ;;  %v5549_v29 = vpop.f32.mrb[102].mxu1 }
 0x505   : > { %4697 = vst [vmem:[%s7385_s9 + $0x68] sm:$0xff] %v4657_v30   ;;  %v3942_v23 = vadd.f32 %v4587_v22, %v3842_v32  ;;  %v3845_v31 = vadd.f32 %v5549_v29, %v7373_v62  ;;  %v3836_v15 = vpop.f32.mrb[103].mxu1 }
 0x506   : > { %4696 = vst [vmem:[%s7385_s9 + $0x60] sm:$0xff] %v4652_v26   ;;  %v3940_v20 = vadd.f32 %v4583_v28, %v3834_v27  ;;  %v3837_v55 = vadd.f32 %v7373_v62, %v3836_v15 }
 0x507   : > { %v3943_v17 = vadd.f32 %v4588_v39, %v3845_v31  ;;  %v3974_v14 = vmax.f32 %v3942_v23, 0.0 }
 0x508   : > { %v3941_v4 = vadd.f32 %v4584_v45, %v3837_v55  ;;  %v3972_v53 = vmax.f32 %v3940_v20, 0.0 }
 0x509   : > { %v3975_v44 = vmax.f32 %v3943_v17, 0.0 }
 0x50a   : > { %v3973_v33 = vmax.f32 %v3941_v4, 0.0 }
 0x50b   : > { %v4667_v34 = vpack.c.bf16 %v3975_v44, %v3974_v14 }
 0x50c   : > { %v4662_v62 = vpack.c.bf16 %v3973_v33, %v3972_v53 }
 0x50d   : > { %4699 = vst [vmem:[%s7385_s9 + $0x78] sm:$0xff] %v4667_v34  }
 0x50e   : > { %4698 = vst [vmem:[%s7385_s9 + $0x70] sm:$0xff] %v4662_v62  }
 0x50f   : > { %6145 = shalt.err (!%p6142_p6)
}
 0x510   : > { %s6146_s29 = scalar_lea.hbm %s7444_s30, 2048  ;;  %s6150_s18 = scalar_lea.hbm %s7576_s17, 4096 }
 0x511   : > { %p6147_p7 = scmp.ne.s32.totalorder %s7444_s30, %s6146_s29  ;;  %p6151_p4 = scmp.lt.u32.totalorder %s7444_s30, %s7576_s17 }
 0x512   : > { %p6152_p12 = scmp.lt.u32.totalorder %s6150_s18, %s6146_s29  ;;  %p6154_p11 = scmp.lt.u32.totalorder %s6146_s29, %s7444_s30 }
 0x513   : > { %p6148_p9 = pnand %p6147_p7, %p7577_p10 }
 0x514   : > { %p6153_p2 = por %p6152_p12, %p6151_p4 }
 0x515   : > { %p6149_p0 = pneg %p6148_p9 }
 0x516   : > { %p6155_p1 = por %p6154_p11, %p6153_p2 }
 0x518   : > { %p6156_p8 = pnand %p6155_p1, %p6149_p0 }
 0x51a   : > { %6159 = shalt.err (!%p6156_p8)
}
 0x51b   : > { %s6240_s27 = smov 64   ;;  %s6241_s11 = smov 4  }
 0x51c   : > { %5760 = dma.vmem_to_hbm [thread:$0]  (%p7577_p10), %s7446_s16, 2048, %s7444_s30, %s4137_s8, %s6240_s27, %s6240_s27, %s6241_s11  }
 0x51d PF: > { %s7578_s3 = sld [smem:[#allocation20_spill]]  ;;  %s7579_s22 = sld [smem:[#allocation26_spill]] }
 0x51e   : > { %s7580_s9 = sld [smem:[#allocation24_spill]] }
 0x523   : > { %s4168_s1 = sand.u32 1, %s7578_s3   ;;  %p7581_p13 = scmp.ne.s32.totalorder %s7579_s22, 0 }
 0x524   : > { %p7582_p5 = scmp.ge.s32.totalorder %s7580_s9, 2  ;;  %s4169_s20 = scalar_lea.sflag [#allocation5], %s4168_s1 }
 0x526   : > { %p5783_p3 = pnand %p7582_p5, %p7581_p13 }
 0x528   : > { %6201 = dma.done.wait (!%p5783_p3), %s4169_s20, 2048  }
 0x529   : > { %6203 = vsyncadd (!%p5783_p3), %s4169_s20, 4294965248  ;;  %s30_s14 = sadd.s32 1, %s7580_s9   ;;  %s7583_s12 = sld [smem:[#allocation21_spill]] }
 0x52a   : > { %p27_p6 = scmp.ge.s32.totalorder %s30_s14, 4   ;;  %s7584_s11 = sld [smem:[#allocation28_spill]] }
 0x52b   : > { %s7585_s6 = sld [smem:[#allocation23_spill]]  ;;  %s7586_s13 = sld [smem:[#allocation27_spill]] }
 0x52c   : > { %s7587_s30 = smov %s6210_s10  ;;  %29 = sbr.rel (!%p27_p6) target bundleno = 16 (0x10), region = 156 }
 0x52f   : > { %s7588_s10 = smov %s7583_s12 }
 0x531   : > { %s7589_s12 = smov %s7585_s6 }
 0x533   :  { %4174 = vsyncpa [#allocation4], 1 }
 0x534   :  { %4176 = vsyncpa [#allocation4 + $0x1], 1 }
 0x535   :  { %4177 = vsyncpa [#allocation7], 1 }
 0x536   :  { %4179 = vsyncpa [#allocation7 + $0x1], 1 }
 0x537   :  { %4180 = vsyncpa [#allocation10], 1 }
 0x538   :  { %4181 = vsyncpa [#allocation13], 1 }
 0x539   :  { %4182 = vsyncpa [#allocation5], 1 }
 0x53a   :  { %4184 = vsyncpa [#allocation5 + $0x1], 1 }

</bundles_post_ra>
